<compile_context>
chip_gen: v7x
topology: tpu7x:2x2x1
jax: 0.10.0
libtpu: 0.0.40
codegen_flags: <defaults>
</compile_context>

<pallas_src>
import functools

import jax
import jax.numpy as jnp
from jax.experimental import pallas as pl
from jax.experimental.pallas import tpu as pltpu


# ----------------------------------------------------------------------------
# Pallas kernel 1: fused  out = leaky_relu(x @ w + b)   (x, w in bf16, f32 acc)
# ----------------------------------------------------------------------------
def _fused_matmul_kernel(x_ref, w_ref, b_ref, o_ref, *, activation):
    acc = jnp.dot(x_ref[...], w_ref[...], preferred_element_type=jnp.float32)
    acc = acc + b_ref[...]                      # (1, N) broadcasts over rows, f32
    if activation == "leaky_relu":
        acc = jnp.where(acc >= 0.0, acc, 0.2 * acc)
    o_ref[...] = acc.astype(o_ref.dtype)


def fused_matmul(x, w, b, *, activation=None, out_dtype=jnp.float32, tile_m=512):
    """activation(x @ w + b), tiled over M with K and N kept whole.

    K <= 1024 and N <= 128 here, so no K accumulator is needed; tiling M gives
    software pipelining (DMA/MXU overlap) and bounds VMEM at large batch.
    Per-step VMEM at tile_m=512, K=1024, N=128, bf16 operands is ~3 MiB, well
    inside the scoped budget on v5e/v6e/v7x.
    """
    M, K = x.shape
    K2, N = w.shape
    assert K == K2
    tile_m = min(tile_m, M)                 # tile_m is either 512 (mult of 8) or == M
    grid_m = pl.cdiv(M, tile_m)
    b2 = b.reshape(1, N).astype(jnp.float32)
    kernel = functools.partial(_fused_matmul_kernel, activation=activation)
    return pl.pallas_call(
        kernel,
        out_shape=jax.ShapeDtypeStruct((M, N), out_dtype),
        grid=(grid_m,),
        in_specs=[
            pl.BlockSpec((tile_m, K), lambda i: (i, 0)),
            pl.BlockSpec((K, N), lambda i: (0, 0)),
            pl.BlockSpec((1, N), lambda i: (0, 0)),
        ],
        out_specs=pl.BlockSpec((tile_m, N), lambda i: (i, 0)),
        compiler_params=pltpu.CompilerParams(
            dimension_semantics=("parallel",),   # megacore split on v7x
        ),
    )(x, w, b2)


# ----------------------------------------------------------------------------
# Pallas kernel 2: final Linear(8192, 1) + Sigmoid as a lane-dense reduction
# ----------------------------------------------------------------------------
def _linear_sigmoid_kernel(x_ref, w_ref, b_ref, o_ref):
    x = x_ref[...].astype(jnp.float32)                     # (tile_b, F)
    w = w_ref[...].astype(jnp.float32)                     # (1, F)
    z = jnp.sum(x * w, axis=-1, keepdims=True) + b_ref[...]  # (tile_b, 1)
    o_ref[...] = (1.0 / (1.0 + jnp.exp(-z))).astype(o_ref.dtype)


def linear_sigmoid(x, w, b, *, tile_b=256):
    """sigmoid(x @ w.T + b) with out_features == 1, done as VPU mul + XLU reduce
    (avoids a lane-padded N=1 MXU matvec and masked output stores)."""
    B, F = x.shape
    assert w.shape == (1, F)
    tile_b = min(tile_b, B)
    grid_b = pl.cdiv(B, tile_b)
    return pl.pallas_call(
        _linear_sigmoid_kernel,
        out_shape=jax.ShapeDtypeStruct((B, 1), jnp.float32),
        grid=(grid_b,),
        in_specs=[
            pl.BlockSpec((tile_b, F), lambda i: (i, 0)),
            pl.BlockSpec((1, F), lambda i: (0, 0)),
            pl.BlockSpec((1, 1), lambda i: (0, 0)),
        ],
        out_specs=pl.BlockSpec((tile_b, 1), lambda i: (i, 0)),
        compiler_params=pltpu.CompilerParams(
            dimension_semantics=("parallel",),
        ),
    )(x, w, b)


# ----------------------------------------------------------------------------
# im2col (k=4, s=2, p=1) on NHWC input, emitting patches directly in the final
# (B*OH*OW, C*KH*KW) layout (feature order matches PyTorch's (Cin, KH, KW)
# weight flattening).  No big transpose pass.
# ----------------------------------------------------------------------------
def _im2col_nhwc(x_nhwc, kernel_size=4, stride=2, padding=1):
    B, H, W, C = x_nhwc.shape
    OH = (H + 2 * padding - kernel_size) // stride + 1
    OW = (W + 2 * padding - kernel_size) // stride + 1
    xp = jnp.pad(x_nhwc, ((0, 0), (padding, padding), (padding, padding), (0, 0)))
    cols = []
    for kh in range(kernel_size):
        for kw in range(kernel_size):
            cols.append(
                xp[:, kh:kh + stride * OH:stride, kw:kw + stride * OW:stride, :]
            )  # (B, OH, OW, C)
    patches = jnp.stack(cols, axis=-1)                 # (B, OH, OW, C, KH*KW)
    patches = patches.reshape(B * OH * OW, C * kernel_size * kernel_size)
    return patches, OH, OW


# ----------------------------------------------------------------------------
# Parameter preparation (one-time reshapes / casts, out of the hot path)
# ----------------------------------------------------------------------------
def _round_up(n, m):
    return ((n + m - 1) // m) * m


def init_params(key, image_channels):
    """PyTorch-layout parameters."""
    k1, k2, k3 = jax.random.split(key, 3)
    scale = 0.02
    return {
        "w1": scale * jax.random.normal(k1, (64, image_channels, 4, 4), jnp.float32),
        "b1": jnp.zeros((64,), jnp.float32),
        "w2": scale * jax.random.normal(k2, (128, 64, 4, 4), jnp.float32),
        "b2": jnp.zeros((128,), jnp.float32),
        "w3": scale * jax.random.normal(k3, (1, 128 * 8 * 8), jnp.float32),  # Linear: (out, in)
        "b3": jnp.zeros((1,), jnp.float32),
    }


def prepare_params(params):
    """Convert PyTorch-layout params to kernel-ready layouts (done once)."""
    w1 = params["w1"]                                    # (64, Cin, 4, 4)
    cout1, cin, kh, kw = w1.shape
    cin_pad = _round_up(cin, 8)                          # K1 = cin_pad*16 is a mult of 128
    w1p = jnp.pad(w1, ((0, 0), (0, cin_pad - cin), (0, 0), (0, 0)))
    w1_2d = w1p.reshape(cout1, cin_pad * kh * kw).T.astype(jnp.bfloat16)   # (K1, 64)

    w2 = params["w2"]                                    # (128, 64, 4, 4)
    cout2 = w2.shape[0]
    w2_2d = w2.reshape(cout2, -1).T.astype(jnp.bfloat16)                   # (1024, 128)

    # Linear weight: PyTorch expects (C, H, W)-flattened input; rearrange the
    # weight once so it matches the NHWC-flattened activations instead.
    w3 = params["w3"].reshape(cout2, 8, 8)               # (C, H, W)
    w3_nhwc = jnp.transpose(w3, (1, 2, 0)).reshape(1, 8 * 8 * cout2).astype(jnp.float32)

    return {
        "w1_2d": w1_2d, "b1": params["b1"].astype(jnp.float32),
        "w2_2d": w2_2d, "b2": params["b2"].astype(jnp.float32),
        "w3_nhwc": w3_nhwc, "b3": params["b3"].reshape(1, 1).astype(jnp.float32),
    }


# ----------------------------------------------------------------------------
# Full Discriminator forward (input x is NCHW, spatial must be 32x32 so the
# flattened feature size matches Linear(128*8*8, 1))
# ----------------------------------------------------------------------------
def discriminator_forward(x_nchw, p):
    B, cin = x_nchw.shape[0], x_nchw.shape[1]
    cin_pad = p["w1_2d"].shape[0] // 16                  # static under jit

    # NCHW -> NHWC once, bf16, channel-pad to a multiple of 8 (full-lane K).
    x = jnp.transpose(x_nchw, (0, 2, 3, 1)).astype(jnp.bfloat16)
    if cin_pad != cin:
        x = jnp.pad(x, ((0, 0), (0, 0), (0, 0), (0, cin_pad - cin)))

    # Conv1 + LeakyReLU  -> NHWC (B, 16, 16, 64), bf16
    patches1, oh1, ow1 = _im2col_nhwc(x)
    h1 = fused_matmul(patches1, p["w1_2d"], p["b1"],
                      activation="leaky_relu", out_dtype=jnp.bfloat16)
    h1 = h1.reshape(B, oh1, ow1, -1)

    # Conv2 + LeakyReLU  -> (B*8*8, 128), bf16
    patches2, oh2, ow2 = _im2col_nhwc(h1)
    h2 = fused_matmul(patches2, p["w2_2d"], p["b2"],
                      activation="leaky_relu", out_dtype=jnp.bfloat16)

    # Flatten in NHWC order (pure reshape, no data movement); the Linear weight
    # was pre-rearranged to the same order, so semantics match PyTorch's
    # (C, H, W) flatten.  Linear(8192, 1) + Sigmoid as a lane-dense reduction.
    flat = h2.reshape(B, oh2 * ow2 * h2.shape[-1])       # (B, 8192)
    return linear_sigmoid(flat, p["w3_nhwc"], p["b3"])   # (B, 1) f32


if __name__ == "__main__":
    key = jax.random.PRNGKey(0)
    kx, kp = jax.random.split(key)
    image_channels = 3
    # Spatial size must be 32 so that 32 -> 16 -> 8 matches Linear(128*8*8, 1).
    x = jax.random.normal(kx, (2, image_channels, 32, 32), jnp.float32)

    params = init_params(kp, image_channels)
    prepared = prepare_params(params)

    fwd = jax.jit(discriminator_forward)
    out = fwd(x, prepared)
    out = jax.block_until_ready(out)

    assert out.shape == (2, 1), out.shape
    assert bool(jnp.all((out >= 0.0) & (out <= 1.0))), "sigmoid output out of range"
    print("KERNEL_OK")
</pallas_src>

<mosaic_0001>
module attributes {stable_mosaic.version = 11 : i64} {
  func.func @_fused_matmul_kernel(%arg0: i32, %arg1: memref<512x128xbf16, #tpu.memory_space<vmem>>, %arg2: memref<128x64xbf16, #tpu.memory_space<vmem>>, %arg3: memref<1x64xf32, #tpu.memory_space<vmem>>, %arg4: memref<512x64xbf16, #tpu.memory_space<vmem>>) attributes {dimension_semantics = [#tpu.dimension_semantics<parallel>], iteration_bounds = array<i64: 1>, scalar_prefetch = 0 : i64, scratch_operands = 0 : i64, tpu.core_type = #tpu.core_type<tc>, window_params = [{transform_indices = @transform_0, window_bounds = array<i64: 512, 128>}, {pipeline_mode = #tpu.pipeline_mode<synchronous>, transform_indices = @transform_1, window_bounds = array<i64: 128, 64>}, {pipeline_mode = #tpu.pipeline_mode<synchronous>, transform_indices = @transform_2, window_bounds = array<i64: 1, 64>}, {transform_indices = @transform_3, window_bounds = array<i64: 512, 64>}]} {
    %c0 = arith.constant 0 : index
    %c0_0 = arith.constant 0 : index
    %0 = vector.load %arg1[%c0, %c0_0] : memref<512x128xbf16, #tpu.memory_space<vmem>>, vector<512x128xbf16>
    %c0_1 = arith.constant 0 : index
    %c0_2 = arith.constant 0 : index
    %1 = vector.load %arg2[%c0_1, %c0_2] : memref<128x64xbf16, #tpu.memory_space<vmem>>, vector<128x64xbf16>
    %cst = arith.constant dense<0.000000e+00> : vector<512x64xf32>
    %2 = tpu.matmul %0, %1, %cst {dimension_numbers = #tpu.dot_dimension_numbers<[1], [0], [0], [1], [0, 0, 1, 1], [], []>} : vector<512x128xbf16>, vector<128x64xbf16>, vector<512x64xf32> -> vector<512x64xf32>
    %c0_3 = arith.constant 0 : index
    %c0_4 = arith.constant 0 : index
    %3 = vector.load %arg3[%c0_3, %c0_4] : memref<1x64xf32, #tpu.memory_space<vmem>>, vector<1x64xf32>
    %4 = vector.broadcast %3 : vector<1x64xf32> to vector<512x64xf32>
    %5 = arith.addf %2, %4 : vector<512x64xf32>
    %cst_5 = arith.constant 0.000000e+00 : f32
    %6 = vector.broadcast %cst_5 : f32 to vector<512x64xf32>
    %7 = arith.cmpf oge, %5, %6 : vector<512x64xf32>
    %cst_6 = arith.constant 2.000000e-01 : f32
    %8 = vector.broadcast %cst_6 : f32 to vector<512x64xf32>
    %9 = arith.mulf %8, %5 : vector<512x64xf32>
    %10 = arith.select %7, %5, %9 : vector<512x64xi1>, vector<512x64xf32>
    %11 = arith.truncf %10 : vector<512x64xf32> to vector<512x64xbf16>
    %c0_7 = arith.constant 0 : index
    %c0_8 = arith.constant 0 : index
    %12 = vector.load %arg4[%c0_7, %c0_8] : memref<512x64xbf16, #tpu.memory_space<vmem>>, vector<512x64xbf16>
    tpu.vector_store %arg4[%c0_7, %c0_8], %11 {strides = array<i32>} : memref<512x64xbf16, #tpu.memory_space<vmem>>, vector<512x64xbf16>,
    return
  }
  func.func @transform_0(%arg0: i32) -> (i32, i32) {
    %c0_i32 = arith.constant 0 : i32
    %c0_i32_0 = arith.constant 0 : i32
    return %arg0, %c0_i32 : i32, i32
  }
  func.func @transform_1(%arg0: i32) -> (i32, i32) {
    %c0_i32 = arith.constant 0 : i32
    %c0_i32_0 = arith.constant 0 : i32
    %c0_i32_1 = arith.constant 0 : i32
    return %c0_i32, %c0_i32_0 : i32, i32
  }
  func.func @transform_2(%arg0: i32) -> (i32, i32) {
    %c0_i32 = arith.constant 0 : i32
    %c0_i32_0 = arith.constant 0 : i32
    %c0_i32_1 = arith.constant 0 : i32
    return %c0_i32, %c0_i32_0 : i32, i32
  }
  func.func @transform_3(%arg0: i32) -> (i32, i32) {
    %c0_i32 = arith.constant 0 : i32
    %c0_i32_0 = arith.constant 0 : i32
    return %arg0, %c0_i32 : i32, i32
  }
}

module attributes {stable_mosaic.version = 11 : i64} {
  func.func @_fused_matmul_kernel(%arg0: i32, %arg1: memref<128x1024xbf16, #tpu.memory_space<vmem>>, %arg2: memref<1024x128xbf16, #tpu.memory_space<vmem>>, %arg3: memref<1x128xf32, #tpu.memory_space<vmem>>, %arg4: memref<128x128xbf16, #tpu.memory_space<vmem>>) attributes {dimension_semantics = [#tpu.dimension_semantics<parallel>], iteration_bounds = array<i64: 1>, scalar_prefetch = 0 : i64, scratch_operands = 0 : i64, tpu.core_type = #tpu.core_type<tc>, window_params = [{transform_indices = @transform_0, window_bounds = array<i64: 128, 1024>}, {pipeline_mode = #tpu.pipeline_mode<synchronous>, transform_indices = @transform_1, window_bounds = array<i64: 1024, 128>}, {pipeline_mode = #tpu.pipeline_mode<synchronous>, transform_indices = @transform_2, window_bounds = array<i64: 1, 128>}, {transform_indices = @transform_3, window_bounds = array<i64: 128, 128>}]} {
    %c0 = arith.constant 0 : index
    %c0_0 = arith.constant 0 : index
    %0 = vector.load %arg1[%c0, %c0_0] : memref<128x1024xbf16, #tpu.memory_space<vmem>>, vector<128x1024xbf16>
    %c0_1 = arith.constant 0 : index
    %c0_2 = arith.constant 0 : index
    %1 = vector.load %arg2[%c0_1, %c0_2] : memref<1024x128xbf16, #tpu.memory_space<vmem>>, vector<1024x128xbf16>
    %cst = arith.constant dense<0.000000e+00> : vector<128x128xf32>
    %2 = tpu.matmul %0, %1, %cst {dimension_numbers = #tpu.dot_dimension_numbers<[1], [0], [0], [1], [0, 0, 1, 1], [], []>} : vector<128x1024xbf16>, vector<1024x128xbf16>, vector<128x128xf32> -> vector<128x128xf32>
    %c0_3 = arith.constant 0 : index
    %c0_4 = arith.constant 0 : index
    %3 = vector.load %arg3[%c0_3, %c0_4] : memref<1x128xf32, #tpu.memory_space<vmem>>, vector<1x128xf32>
    %4 = vector.broadcast %3 : vector<1x128xf32> to vector<128x128xf32>
    %5 = arith.addf %2, %4 : vector<128x128xf32>
    %cst_5 = arith.constant 0.000000e+00 : f32
    %6 = vector.broadcast %cst_5 : f32 to vector<128x128xf32>
    %7 = arith.cmpf oge, %5, %6 : vector<128x128xf32>
    %cst_6 = arith.constant 2.000000e-01 : f32
    %8 = vector.broadcast %cst_6 : f32 to vector<128x128xf32>
    %9 = arith.mulf %8, %5 : vector<128x128xf32>
    %10 = arith.select %7, %5, %9 : vector<128x128xi1>, vector<128x128xf32>
    %11 = arith.truncf %10 : vector<128x128xf32> to vector<128x128xbf16>
    %c0_7 = arith.constant 0 : index
    %c0_8 = arith.constant 0 : index
    %12 = vector.load %arg4[%c0_7, %c0_8] : memref<128x128xbf16, #tpu.memory_space<vmem>>, vector<128x128xbf16>
    tpu.vector_store %arg4[%c0_7, %c0_8], %11 {strides = array<i32>} : memref<128x128xbf16, #tpu.memory_space<vmem>>, vector<128x128xbf16>,
    return
  }
  func.func @transform_0(%arg0: i32) -> (i32, i32) {
    %c0_i32 = arith.constant 0 : i32
    %c0_i32_0 = arith.constant 0 : i32
    return %arg0, %c0_i32 : i32, i32
  }
  func.func @transform_1(%arg0: i32) -> (i32, i32) {
    %c0_i32 = arith.constant 0 : i32
    %c0_i32_0 = arith.constant 0 : i32
    %c0_i32_1 = arith.constant 0 : i32
    return %c0_i32, %c0_i32_0 : i32, i32
  }
  func.func @transform_2(%arg0: i32) -> (i32, i32) {
    %c0_i32 = arith.constant 0 : i32
    %c0_i32_0 = arith.constant 0 : i32
    %c0_i32_1 = arith.constant 0 : i32
    return %c0_i32, %c0_i32_0 : i32, i32
  }
  func.func @transform_3(%arg0: i32) -> (i32, i32) {
    %c0_i32 = arith.constant 0 : i32
    %c0_i32_0 = arith.constant 0 : i32
    return %arg0, %c0_i32 : i32, i32
  }
}

module attributes {stable_mosaic.version = 11 : i64} {
  func.func @_linear_sigmoid_kernel(%arg0: i32, %arg1: memref<2x8192xbf16, #tpu.memory_space<vmem>>, %arg2: memref<1x8192xf32, #tpu.memory_space<vmem>>, %arg3: memref<1x1xf32, #tpu.memory_space<vmem>>, %arg4: memref<2x1xf32, #tpu.memory_space<vmem>>) attributes {dimension_semantics = [#tpu.dimension_semantics<parallel>], iteration_bounds = array<i64: 1>, scalar_prefetch = 0 : i64, scratch_operands = 0 : i64, tpu.core_type = #tpu.core_type<tc>, window_params = [{transform_indices = @transform_0, window_bounds = array<i64: 2, 8192>}, {pipeline_mode = #tpu.pipeline_mode<synchronous>, transform_indices = @transform_1, window_bounds = array<i64: 1, 8192>}, {pipeline_mode = #tpu.pipeline_mode<synchronous>, transform_indices = @transform_2, window_bounds = array<i64: 1, 1>}, {transform_indices = @transform_3, window_bounds = array<i64: 2, 1>}]} {
    %c0 = arith.constant 0 : index
    %c0_0 = arith.constant 0 : index
    %0 = vector.load %arg1[%c0, %c0_0] : memref<2x8192xbf16, #tpu.memory_space<vmem>>, vector<2x8192xbf16>
    %1 = arith.extf %0 : vector<2x8192xbf16> to vector<2x8192xf32>
    %c0_1 = arith.constant 0 : index
    %c0_2 = arith.constant 0 : index
    %2 = vector.load %arg2[%c0_1, %c0_2] : memref<1x8192xf32, #tpu.memory_space<vmem>>, vector<1x8192xf32>
    %3 = vector.broadcast %2 : vector<1x8192xf32> to vector<2x8192xf32>
    %4 = arith.mulf %1, %3 : vector<2x8192xf32>
    %cst = arith.constant dense<0.000000e+00> : vector<2xf32>
    %5 = vector.multi_reduction <add>, %4, %cst [1] : vector<2x8192xf32> to vector<2xf32>
    %6 = vector.shape_cast %5 : vector<2xf32> to vector<2x1xf32>
    %c0_3 = arith.constant 0 : index
    %c0_4 = arith.constant 0 : index
    %7 = vector.load %arg3[%c0_3, %c0_4] : memref<1x1xf32, #tpu.memory_space<vmem>>, vector<1x1xf32>
    %8 = vector.broadcast %7 : vector<1x1xf32> to vector<2x1xf32>
    %9 = arith.addf %6, %8 : vector<2x1xf32>
    %cst_5 = arith.constant 0.000000e+00 : f32
    %10 = vector.broadcast %cst_5 : f32 to vector<2x1xf32>
    %11 = arith.subf %10, %9 : vector<2x1xf32>
    %12 = math.exp %11 : vector<2x1xf32>
    %cst_6 = arith.constant 1.000000e+00 : f32
    %13 = vector.broadcast %cst_6 : f32 to vector<2x1xf32>
    %14 = arith.addf %13, %12 : vector<2x1xf32>
    %cst_7 = arith.constant 1.000000e+00 : f32
    %15 = vector.broadcast %cst_7 : f32 to vector<2x1xf32>
    %16 = arith.divf %15, %14 : vector<2x1xf32>
    %c0_8 = arith.constant 0 : index
    %c0_9 = arith.constant 0 : index
    %17 = vector.load %arg4[%c0_8, %c0_9] : memref<2x1xf32, #tpu.memory_space<vmem>>, vector<2x1xf32>
    tpu.vector_store %arg4[%c0_8, %c0_9], %16 {strides = array<i32>} : memref<2x1xf32, #tpu.memory_space<vmem>>, vector<2x1xf32>,
    return
  }
  func.func @transform_0(%arg0: i32) -> (i32, i32) {
    %c0_i32 = arith.constant 0 : i32
    %c0_i32_0 = arith.constant 0 : i32
    return %arg0, %c0_i32 : i32, i32
  }
  func.func @transform_1(%arg0: i32) -> (i32, i32) {
    %c0_i32 = arith.constant 0 : i32
    %c0_i32_0 = arith.constant 0 : i32
    %c0_i32_1 = arith.constant 0 : i32
    return %c0_i32, %c0_i32_0 : i32, i32
  }
  func.func @transform_2(%arg0: i32) -> (i32, i32) {
    %c0_i32 = arith.constant 0 : i32
    %c0_i32_0 = arith.constant 0 : i32
    %c0_i32_1 = arith.constant 0 : i32
    return %c0_i32, %c0_i32_0 : i32, i32
  }
  func.func @transform_3(%arg0: i32) -> (i32, i32) {
    %c0_i32 = arith.constant 0 : i32
    %c0_i32_0 = arith.constant 0 : i32
    return %arg0, %c0_i32 : i32, i32
  }
}

</mosaic_0001>

<bundles_post_ra>
// kernel: discriminator_forward.3
= control target key start
LH: loop header
LB: loop body
LE: loop exit
PB: predicated region body
PF: predicated region fallthrough
CT: control target
= control target key end

     0   :  { %vm1079_vm0 = vcmask 519168   ;;  %s2037_s1 = inlined_call_operand.vmem [shape: bf16[128,64], index: 1, kind: input, shape index: {}]   ;;  %s2038_s0 = inlined_call_operand.vmem [shape: bf16[512,128], index: 0, kind: input, shape index: {}]   ;;  %s2039_s2 = inlined_call_operand.vmem [shape: f32[1,64], index: 2, kind: input, shape index: {}]   ;;  %s2040_s3 = inlined_call_operand.vmem [shape: bf16[512,64], index: 3, kind: output, shape index: {}]  }
   0x1   :  { %v1453_v0 = vld [vmem:[%s2037_s1] sm:$0xff]   ;;  %v1454_v1 = vld [vmem:[%s2037_s1 + $0x8] sm:$0xff]   ;;  %v1455_v2 = vld [vmem:[%s2037_s1 + $0x10] sm:$0xff]  }
   0x2   :  { %1357 = vmatprep.subr.bf16.mxu0 %v1453_v0  ;;  %1437 = vmatprep.subr.bf16.mxu1 %v1453_v0  ;;  %v1456_v3 = vld [vmem:[%s2037_s1 + $0x18] sm:$0xff]   ;;  %v1461_v4 = vld [vmem:[%s2038_s0] sm:$0xff]   ;;  %v1458_v7 = vld [vmem:[%s2037_s1 + $0x28] sm:$0xff]  }
   0x3   :  { %1358 = vmatpush3.bf16.msra.mxu0 %v1453_v0  ;;  %1445 = vmatpush3.bf16.msra.mxu1 %v1453_v0  ;;  %v1462_v5 = vld [vmem:[%s2038_s0 + $0x80] sm:$0xff]   ;;  %v1459_v8 = vld [vmem:[%s2037_s1 + $0x30] sm:$0xff]   ;;  %v1460_v9 = vld [vmem:[%s2037_s1 + $0x38] sm:$0xff]  }
   0x4   :  { %1359 = vmatprep.subr.bf16.mxu0 %v1454_v1  ;;  %1438 = vmatprep.subr.bf16.mxu1 %v1454_v1  ;;  %v1457_v6 = vld [vmem:[%s2037_s1 + $0x20] sm:$0xff]   ;;  %v1463_v10 = vld [vmem:[%s2038_s0 + $0x8] sm:$0xff]   ;;  %v1465_v12 = vld [vmem:[%s2038_s0 + $0x10] sm:$0xff]  }
   0x5   :  { %1373 = vmatprep.mubr.bf16.mxu0 %v1461_v4  ;;  %1405 = vmatprep.mubr.bf16.mxu1 %v1462_v5  ;;  %v1464_v11 = vld [vmem:[%s2038_s0 + $0x88] sm:$0xff]   ;;  %v1466_v13 = vld [vmem:[%s2038_s0 + $0x90] sm:$0xff]   ;;  %v1467_v14 = vld [vmem:[%s2038_s0 + $0x18] sm:$0xff]  }
   0x6   :  { %v1468_v15 = vld [vmem:[%s2038_s0 + $0x98] sm:$0xff]   ;;  %v1469_v16 = vld [vmem:[%s2038_s0 + $0x20] sm:$0xff]   ;;  %v1471_v18 = vld [vmem:[%s2038_s0 + $0x28] sm:$0xff]  }
   0x7   :  { %1360 = vmatpush3.bf16.msra.mxu0 %v1454_v1  ;;  %1446 = vmatpush3.bf16.msra.mxu1 %v1454_v1  ;;  %v1470_v17 = vld [vmem:[%s2038_s0 + $0xa0] sm:$0xff]   ;;  %v1472_v19 = vld [vmem:[%s2038_s0 + $0xa8] sm:$0xff]   ;;  %v1473_v20 = vld [vmem:[%s2038_s0 + $0x30] sm:$0xff]  }
   0x8   :  { %1361 = vmatprep.subr.bf16.mxu0 %v1455_v2  ;;  %1439 = vmatprep.subr.bf16.mxu1 %v1455_v2  ;;  %v1474_v21 = vld [vmem:[%s2038_s0 + $0xb0] sm:$0xff]   ;;  %v1475_v22 = vld [vmem:[%s2038_s0 + $0x38] sm:$0xff]   ;;  %v1477_v24 = vld [vmem:[%s2038_s0 + $0x40] sm:$0xff]  }
   0x9   :  { %v1476_v23 = vld [vmem:[%s2038_s0 + $0xb8] sm:$0xff]   ;;  %v1478_v25 = vld [vmem:[%s2038_s0 + $0xc0] sm:$0xff]   ;;  %v1479_v26 = vld [vmem:[%s2038_s0 + $0x48] sm:$0xff]  }
   0xa   :  { %v1480_v27 = vld [vmem:[%s2038_s0 + $0xc8] sm:$0xff]   ;;  %v1481_v28 = vld [vmem:[%s2038_s0 + $0x50] sm:$0xff]   ;;  %v1483_v30 = vld [vmem:[%s2038_s0 + $0x58] sm:$0xff]  }
   0xb   :  { %1362 = vmatpush3.bf16.msra.mxu0 %v1455_v2  ;;  %1447 = vmatpush3.bf16.msra.mxu1 %v1455_v2  ;;  %v1482_v29 = vld [vmem:[%s2038_s0 + $0xd0] sm:$0xff]   ;;  %v1484_v31 = vld [vmem:[%s2038_s0 + $0xd8] sm:$0xff]   ;;  %v1485_v32 = vld [vmem:[%s2038_s0 + $0x60] sm:$0xff]  }
   0xc   :  { %1363 = vmatprep.subr.bf16.mxu0 %v1456_v3  ;;  %1440 = vmatprep.subr.bf16.mxu1 %v1456_v3  ;;  %v1486_v33 = vld [vmem:[%s2038_s0 + $0xe0] sm:$0xff]   ;;  %v1487_v34 = vld [vmem:[%s2038_s0 + $0x68] sm:$0xff]   ;;  %v1489_v36 = vld [vmem:[%s2038_s0 + $0x70] sm:$0xff]  }
   0xd   :  { %v1488_v35 = vld [vmem:[%s2038_s0 + $0xe8] sm:$0xff]   ;;  %v1490_v37 = vld [vmem:[%s2038_s0 + $0xf0] sm:$0xff]   ;;  %v1491_v38 = vld [vmem:[%s2038_s0 + $0x78] sm:$0xff]  }
   0xe   :  { %v1492_v39 = vld [vmem:[%s2038_s0 + $0xf8] sm:$0xff]   ;;  %v1636_v40 = vld [vmem:[%s2039_s2] ss:$0 sm:$0xff] }
   0xf   :  { %1364 = vmatpush3.bf16.msra.mxu0 %v1456_v3  ;;  %1448 = vmatpush3.bf16.msra.mxu1 %v1456_v3 }
  0x10   :  { %1365 = vmatprep.subr.bf16.mxu0 %v1457_v6  ;;  %1441 = vmatprep.subr.bf16.mxu1 %v1457_v6 }
  0x13   :  { %1366 = vmatpush3.bf16.msra.mxu0 %v1457_v6  ;;  %1449 = vmatpush3.bf16.msra.mxu1 %v1457_v6 }
  0x14   :  { %1367 = vmatprep.subr.bf16.mxu0 %v1458_v7  ;;  %1442 = vmatprep.subr.bf16.mxu1 %v1458_v7 }
  0x17   :  { %1368 = vmatpush3.bf16.msra.mxu0 %v1458_v7  ;;  %1450 = vmatpush3.bf16.msra.mxu1 %v1458_v7 }
  0x18   :  { %1369 = vmatprep.subr.bf16.mxu0 %v1459_v8  ;;  %1443 = vmatprep.subr.bf16.mxu1 %v1459_v8 }
  0x1b   :  { %1370 = vmatpush3.bf16.msra.mxu0 %v1459_v8  ;;  %1451 = vmatpush3.bf16.msra.mxu1 %v1459_v8 }
  0x1c   :  { %1371 = vmatprep.subr.bf16.mxu0 %v1460_v9  ;;  %1444 = vmatprep.subr.bf16.mxu1 %v1460_v9 }
  0x1f   :  { %1372 = vmatpush3.bf16.msra.mxu0 %v1460_v9  ;;  %1452 = vmatpush3.bf16.msra.mxu1 %v1460_v9 }
  0x22   :  { %1374 = vmatmul.mubr.bf16.vlgmr.msra.gmra.mrb[0].mxu0 %v1463_v10  ;;  %1406 = vmatmul.mubr.bf16.vlgmr.msra.gmra.mrb[0].mxu1 %v1464_v11 }
  0x23   :  { %1377 = vmatprep.mubr.bf16.mxu0 %v1465_v12  ;;  %1409 = vmatprep.mubr.bf16.mxu1 %v1466_v13 }
  0x2a   :  { %1378 = vmatmul.mubr.bf16.gmra.mrb[4].mxu0 %v1467_v14  ;;  %1410 = vmatmul.mubr.bf16.gmra.mrb[4].mxu1 %v1468_v15 }
  0x2b   :  { %1381 = vmatprep.mubr.bf16.mxu0 %v1469_v16  ;;  %1413 = vmatprep.mubr.bf16.mxu1 %v1470_v17 }
  0x32   :  { %1382 = vmatmul.mubr.bf16.gmra.mrb[8].mxu0 %v1471_v18  ;;  %1414 = vmatmul.mubr.bf16.gmra.mrb[8].mxu1 %v1472_v19 }
  0x33   :  { %1385 = vmatprep.mubr.bf16.mxu0 %v1473_v20  ;;  %1417 = vmatprep.mubr.bf16.mxu1 %v1474_v21 }
  0x3a   :  { %1386 = vmatmul.mubr.bf16.gmra.mrb[12].mxu0 %v1475_v22  ;;  %1418 = vmatmul.mubr.bf16.gmra.mrb[12].mxu1 %v1476_v23 }
  0x3b   :  { %1389 = vmatprep.mubr.bf16.mxu0 %v1477_v24  ;;  %1421 = vmatprep.mubr.bf16.mxu1 %v1478_v25 }
  0x42   :  { %1390 = vmatmul.mubr.bf16.gmra.mrb[16].mxu0 %v1479_v26  ;;  %1422 = vmatmul.mubr.bf16.gmra.mrb[16].mxu1 %v1480_v27 }
  0x43   :  { %1393 = vmatprep.mubr.bf16.mxu0 %v1481_v28  ;;  %1425 = vmatprep.mubr.bf16.mxu1 %v1482_v29 }
  0x4a   :  { %1394 = vmatmul.mubr.bf16.gmra.mrb[20].mxu0 %v1483_v30  ;;  %1426 = vmatmul.mubr.bf16.gmra.mrb[20].mxu1 %v1484_v31 }
  0x4b   :  { %1397 = vmatprep.mubr.bf16.mxu0 %v1485_v32  ;;  %1429 = vmatprep.mubr.bf16.mxu1 %v1486_v33 }
  0x52   :  { %1398 = vmatmul.mubr.bf16.gmra.mrb[24].mxu0 %v1487_v34  ;;  %1430 = vmatmul.mubr.bf16.gmra.mrb[24].mxu1 %v1488_v35 }
  0x53   :  { %1401 = vmatprep.mubr.bf16.mxu0 %v1489_v36  ;;  %1433 = vmatprep.mubr.bf16.mxu1 %v1490_v37 }
  0x5a   :  { %1402 = vmatmul.mubr.bf16.gmra.mrb[28].mxu0 %v1491_v38  ;;  %1434 = vmatmul.mubr.bf16.gmra.mrb[28].mxu1 %v1492_v39 }
  0xf5   :  { %v1375_v41 = vpop.f32.mrb[0].mxu0  ;;  %v1407_v42 = vpop.f32.mrb[0].mxu1 }
  0xf6   :  { %v385_v43 = vadd.f32 %v1375_v41, %v1636_v40  ;;  %v513_v44 = vadd.f32 %v1407_v42, %v1636_v40  ;;  %v376_v45 = vpop.f32.mrb[1].mxu0  ;;  %v504_v46 = vpop.f32.mrb[1].mxu1 }
  0xf7   :  { %v377_v47 = vadd.f32 %v1636_v40, %v376_v45  ;;  %v505_v48 = vadd.f32 %v1636_v40, %v504_v46  ;;  %v1376_v49 = vpop.f32.mrb[2].mxu0  ;;  %v1408_v50 = vpop.f32.mrb[2].mxu1 }
  0xf8   :  { %vm633_vm1 = vcmp.ge.f32.partialorder %v385_v43, 0.0  ;;  %v697_v51 = vmul.f32 0.2, %v385_v43  ;;  %vm665_vm2 = vcmp.ge.f32.partialorder %v513_v44, 0.0  ;;  %v729_v52 = vmul.f32 0.2, %v513_v44 }
  0xf9   :  { %vm631_vm3 = vcmp.ge.f32.partialorder %v377_v47, 0.0  ;;  %v695_v53 = vmul.f32 0.2, %v377_v47  ;;  %vm663_vm4 = vcmp.ge.f32.partialorder %v505_v48, 0.0  ;;  %v727_v54 = vmul.f32 0.2, %v505_v48 }
  0xfa   :  { %v761_v55 = vsel %vm633_vm1, %v385_v43, %v697_v51  ;;  %v793_v56 = vsel %vm665_vm2, %v513_v44, %v729_v52  ;;  %v388_v57 = vadd.f32 %v1376_v49, %v1636_v40  ;;  %v516_v58 = vadd.f32 %v1408_v50, %v1636_v40  ;;  %v379_v59 = vpop.f32.mrb[3].mxu0  ;;  %v507_v60 = vpop.f32.mrb[3].mxu1 }
  0xfb   :  { %v1255_v61 = vpack.c.bf16 %v761_v55, %v761_v55  ;;  %v1287_v62 = vpack.c.bf16 %v793_v56, %v793_v56  ;;  %v759_v63 = vsel %vm631_vm3, %v377_v47, %v695_v53  ;;  %v791_v0 = vsel %vm663_vm4, %v505_v48, %v727_v54 }
  0xfc   :  { %v1253_v1 = vpack.c.bf16 %v759_v63, %v759_v63  ;;  %v1285_v2 = vpack.c.bf16 %v791_v0, %v791_v0  ;;  %vm634_vm5 = vcmp.ge.f32.partialorder %v388_v57, 0.0  ;;  %v698_v3 = vmul.f32 0.2, %v388_v57 }
  0xfd   :  { %1082 = vst.msk [vmem:[%s2040_s3 + $0x8] sm:$0xf] %vm1079_vm0, %v1255_v61  ;;  %1114 = vst.msk [vmem:[%s2040_s3 + $0x88] sm:$0xf] %vm1079_vm0, %v1287_v62  ;;  %vm666_vm6 = vcmp.ge.f32.partialorder %v516_v58, 0.0  ;;  %v380_v5 = vadd.f32 %v1636_v40, %v379_v59  ;;  %v508_v6 = vadd.f32 %v1636_v40, %v507_v60  ;;  %v1379_v7 = vpop.f32.mrb[4].mxu0 }
  0xfe   :  { %v730_v4 = vmul.f32 0.2, %v516_v58  ;;  %v1411_v8 = vpop.f32.mrb[4].mxu1  ;;  %1080 = vst.msk [vmem:[%s2040_s3] sm:$0xf] %vm1079_vm0, %v1253_v1  ;;  %v762_v9 = vsel %vm634_vm5, %v388_v57, %v698_v3  ;;  %v401_v10 = vadd.f32 %v1379_v7, %v1636_v40  ;;  %v392_v12 = vpop.f32.mrb[5].mxu0 }
  0xff   :  { %1112 = vst.msk [vmem:[%s2040_s3 + $0x80] sm:$0xf] %vm1079_vm0, %v1285_v2  ;;  %v529_v11 = vadd.f32 %v1411_v8, %v1636_v40  ;;  %v520_v13 = vpop.f32.mrb[5].mxu1  ;;  %v1256_v14 = vpack.c.bf16 %v762_v9, %v762_v9  ;;  %vm632_vm7 = vcmp.ge.f32.partialorder %v380_v5, 0.0  ;;  %v696_v16 = vmul.f32 0.2, %v380_v5 }
 0x100   :  { %v794_v15 = vsel %vm666_vm6, %v516_v58, %v730_v4  ;;  %v1380_v17 = vpop.f32.mrb[6].mxu0  ;;  %v1412_v18 = vpop.f32.mrb[6].mxu1  ;;  %vm664_vm8 = vcmp.ge.f32.partialorder %v508_v6, 0.0  ;;  %v728_v20 = vmul.f32 0.2, %v508_v6  ;;  %vm637_vm9 = vcmp.ge.f32.partialorder %v401_v10, 0.0 }
 0x101   :  { %v1288_v19 = vpack.c.bf16 %v794_v15, %v794_v15  ;;  %v395_v21 = vpop.f32.mrb[7].mxu0  ;;  %v523_v22 = vpop.f32.mrb[7].mxu1  ;;  %1083 = vst.msk [vmem:[%s2040_s3 + $0xc] sm:$0xf] %vm1079_vm0, %v1256_v14  ;;  %v760_v23 = vsel %vm632_vm7, %v380_v5, %v696_v16  ;;  %v701_v24 = vmul.f32 0.2, %v401_v10  ;;  %v393_v28 = vadd.f32 %v1636_v40, %v392_v12 }
 0x102   :  { %vm669_vm10 = vcmp.ge.f32.partialorder %v529_v11, 0.0  ;;  %v733_v25 = vmul.f32 0.2, %v529_v11  ;;  %v1254_v26 = vpack.c.bf16 %v760_v23, %v760_v23  ;;  %v792_v27 = vsel %vm664_vm8, %v508_v6, %v728_v20 }
 0x103   :  { %1115 = vst.msk [vmem:[%s2040_s3 + $0x8c] sm:$0xf] %vm1079_vm0, %v1288_v19  ;;  %v521_v29 = vadd.f32 %v1636_v40, %v520_v13  ;;  %v1286_v30 = vpack.c.bf16 %v792_v27, %v792_v27  ;;  %v765_v31 = vsel %vm637_vm9, %v401_v10, %v701_v24  ;;  %v404_v33 = vadd.f32 %v1380_v17, %v1636_v40 }
 0x104   :  { %v797_v32 = vsel %vm669_vm10, %v529_v11, %v733_v25  ;;  %1081 = vst.msk [vmem:[%s2040_s3 + $0x4] sm:$0xf] %vm1079_vm0, %v1254_v26  ;;  %v1259_v34 = vpack.c.bf16 %v765_v31, %v765_v31  ;;  %vm635_vm11 = vcmp.ge.f32.partialorder %v393_v28, 0.0  ;;  %v699_v36 = vmul.f32 0.2, %v393_v28 }
 0x105   :  { %v1291_v35 = vpack.c.bf16 %v797_v32, %v797_v32  ;;  %1113 = vst.msk [vmem:[%s2040_s3 + $0x84] sm:$0xf] %vm1079_vm0, %v1286_v30  ;;  %vm667_vm12 = vcmp.ge.f32.partialorder %v521_v29, 0.0  ;;  %v731_v37 = vmul.f32 0.2, %v521_v29  ;;  %vm638_vm13 = vcmp.ge.f32.partialorder %v404_v33, 0.0 }
 0x106   :  { %v702_v38 = vmul.f32 0.2, %v404_v33  ;;  %1086 = vst.msk [vmem:[%s2040_s3 + $0x18] sm:$0xf] %vm1079_vm0, %v1259_v34  ;;  %v763_v39 = vsel %vm635_vm11, %v393_v28, %v699_v36  ;;  %v532_v41 = vadd.f32 %v1412_v18, %v1636_v40  ;;  %v396_v42 = vadd.f32 %v1636_v40, %v395_v21  ;;  %v1383_v44 = vpop.f32.mrb[8].mxu0  ;;  %v1415_v45 = vpop.f32.mrb[8].mxu1 }
 0x107   :  { %1118 = vst.msk [vmem:[%s2040_s3 + $0x98] sm:$0xf] %vm1079_vm0, %v1291_v35  ;;  %v524_v43 = vadd.f32 %v1636_v40, %v523_v22  ;;  %v1257_v46 = vpack.c.bf16 %v763_v39, %v763_v39  ;;  %v795_v47 = vsel %vm667_vm12, %v521_v29, %v731_v37  ;;  %v417_v49 = vadd.f32 %v1383_v44, %v1636_v40  ;;  %v408_v50 = vpop.f32.mrb[9].mxu0  ;;  %v536_v51 = vpop.f32.mrb[9].mxu1 }
 0x108   :  { %v766_v48 = vsel %vm638_vm13, %v404_v33, %v702_v38  ;;  %v1289_v52 = vpack.c.bf16 %v795_v47, %v795_v47  ;;  %vm670_vm14 = vcmp.ge.f32.partialorder %v532_v41, 0.0  ;;  %v734_v54 = vmul.f32 0.2, %v532_v41  ;;  %v1384_v55 = vpop.f32.mrb[10].mxu0  ;;  %v1416_v56 = vpop.f32.mrb[10].mxu1 }
 0x109   :  { %v1260_v53 = vpack.c.bf16 %v766_v48, %v766_v48  ;;  %1084 = vst.msk [vmem:[%s2040_s3 + $0x10] sm:$0xf] %vm1079_vm0, %v1257_v46  ;;  %vm636_vm15 = vcmp.ge.f32.partialorder %v396_v42, 0.0  ;;  %v700_v57 = vmul.f32 0.2, %v396_v42  ;;  %vm668_vm1 = vcmp.ge.f32.partialorder %v524_v43, 0.0 }
 0x10a   :  { %v732_v58 = vmul.f32 0.2, %v524_v43  ;;  %1116 = vst.msk [vmem:[%s2040_s3 + $0x90] sm:$0xf] %vm1079_vm0, %v1289_v52  ;;  %v798_v59 = vsel %vm670_vm14, %v532_v41, %v734_v54  ;;  %vm641_vm2 = vcmp.ge.f32.partialorder %v417_v49, 0.0  ;;  %v545_v61 = vadd.f32 %v1415_v45, %v1636_v40  ;;  %v411_v62 = vpop.f32.mrb[11].mxu0 }
 0x10b   :  { %1087 = vst.msk [vmem:[%s2040_s3 + $0x1c] sm:$0xf] %vm1079_vm0, %v1260_v53  ;;  %v705_v60 = vmul.f32 0.2, %v417_v49  ;;  %v539_v63 = vpop.f32.mrb[11].mxu1  ;;  %v1292_v0 = vpack.c.bf16 %v798_v59, %v798_v59  ;;  %v764_v1 = vsel %vm636_vm15, %v396_v42, %v700_v57  ;;  %v409_v3 = vadd.f32 %v1636_v40, %v408_v50 }
 0x10c   :  { %v796_v2 = vsel %vm668_vm1, %v524_v43, %v732_v58  ;;  %v1258_v4 = vpack.c.bf16 %v764_v1, %v764_v1  ;;  %vm673_vm3 = vcmp.ge.f32.partialorder %v545_v61, 0.0  ;;  %v737_v8 = vmul.f32 0.2, %v545_v61 }
 0x10d   :  { %v1290_v5 = vpack.c.bf16 %v796_v2, %v796_v2  ;;  %v769_v6 = vsel %vm641_vm2, %v417_v49, %v705_v60  ;;  %1119 = vst.msk [vmem:[%s2040_s3 + $0x9c] sm:$0xf] %vm1079_vm0, %v1292_v0  ;;  %vm639_vm4 = vcmp.ge.f32.partialorder %v409_v3, 0.0  ;;  %v703_v9 = vmul.f32 0.2, %v409_v3  ;;  %v1387_v10 = vpop.f32.mrb[12].mxu0 }
 0x10e   :  { %v1263_v7 = vpack.c.bf16 %v769_v6, %v769_v6  ;;  %1085 = vst.msk [vmem:[%s2040_s3 + $0x14] sm:$0xf] %vm1079_vm0, %v1258_v4  ;;  %v537_v11 = vadd.f32 %v1636_v40, %v536_v51  ;;  %v420_v12 = vadd.f32 %v1384_v55, %v1636_v40  ;;  %v548_v13 = vadd.f32 %v1416_v56, %v1636_v40  ;;  %v1419_v15 = vpop.f32.mrb[12].mxu1  ;;  %v424_v16 = vpop.f32.mrb[13].mxu0 }
 0x10f   :  { %1117 = vst.msk [vmem:[%s2040_s3 + $0x94] sm:$0xf] %vm1079_vm0, %v1290_v5  ;;  %v412_v14 = vadd.f32 %v1636_v40, %v411_v62  ;;  %v801_v17 = vsel %vm673_vm3, %v545_v61, %v737_v8  ;;  %v767_v18 = vsel %vm639_vm4, %v409_v3, %v703_v9  ;;  %v540_v19 = vadd.f32 %v1636_v40, %v539_v63  ;;  %v552_v21 = vpop.f32.mrb[13].mxu1  ;;  %v1388_v22 = vpop.f32.mrb[14].mxu0 }
 0x110   :  { %1090 = vst.msk [vmem:[%s2040_s3 + $0x28] sm:$0xf] %vm1079_vm0, %v1263_v7  ;;  %v433_v20 = vadd.f32 %v1387_v10, %v1636_v40  ;;  %v1295_v23 = vpack.c.bf16 %v801_v17, %v801_v17  ;;  %v1261_v24 = vpack.c.bf16 %v767_v18, %v767_v18  ;;  %vm671_vm5 = vcmp.ge.f32.partialorder %v537_v11, 0.0  ;;  %v1420_v26 = vpop.f32.mrb[14].mxu1  ;;  %v427_v27 = vpop.f32.mrb[15].mxu0 }
 0x111   :  { %v735_v25 = vmul.f32 0.2, %v537_v11  ;;  %vm642_vm6 = vcmp.ge.f32.partialorder %v420_v12, 0.0  ;;  %v706_v28 = vmul.f32 0.2, %v420_v12  ;;  %vm674_vm7 = vcmp.ge.f32.partialorder %v548_v13, 0.0 }
 0x112   :  { %v738_v29 = vmul.f32 0.2, %v548_v13  ;;  %1122 = vst.msk [vmem:[%s2040_s3 + $0xa8] sm:$0xf] %vm1079_vm0, %v1295_v23  ;;  %1088 = vst.msk [vmem:[%s2040_s3 + $0x20] sm:$0xf] %vm1079_vm0, %v1261_v24  ;;  %v561_v44 = vadd.f32 %v1419_v15, %v1636_v40  ;;  %v425_v48 = vadd.f32 %v1636_v40, %v424_v16  ;;  %v553_v49 = vadd.f32 %v1636_v40, %v552_v21 }
 0x113   :  { %v799_v30 = vsel %vm671_vm5, %v537_v11, %v735_v25  ;;  %vm640_vm8 = vcmp.ge.f32.partialorder %v412_v14, 0.0  ;;  %v704_v31 = vmul.f32 0.2, %v412_v14  ;;  %vm672_vm9 = vcmp.ge.f32.partialorder %v540_v19, 0.0  ;;  %v555_v32 = vpop.f32.mrb[15].mxu1 }
 0x114   :  { %v1293_v33 = vpack.c.bf16 %v799_v30, %v799_v30  ;;  %v770_v34 = vsel %vm642_vm6, %v420_v12, %v706_v28  ;;  %v802_v35 = vsel %vm674_vm7, %v548_v13, %v738_v29  ;;  %v736_v36 = vmul.f32 0.2, %v540_v19 }
 0x115   :  { %v1264_v37 = vpack.c.bf16 %v770_v34, %v770_v34  ;;  %v1296_v38 = vpack.c.bf16 %v802_v35, %v802_v35  ;;  %v768_v39 = vsel %vm640_vm8, %v412_v14, %v704_v31  ;;  %vm645_vm10 = vcmp.ge.f32.partialorder %v433_v20, 0.0  ;;  %v1391_v45 = vpop.f32.mrb[16].mxu0  ;;  %v1423_v46 = vpop.f32.mrb[16].mxu1 }
 0x116   :  { %1120 = vst.msk [vmem:[%s2040_s3 + $0xa0] sm:$0xf] %vm1079_vm0, %v1293_v33  ;;  %v1262_v41 = vpack.c.bf16 %v768_v39, %v768_v39  ;;  %v800_v42 = vsel %vm672_vm9, %v540_v19, %v736_v36  ;;  %v709_v43 = vmul.f32 0.2, %v433_v20  ;;  %v436_v50 = vadd.f32 %v1388_v22, %v1636_v40  ;;  %v440_v51 = vpop.f32.mrb[17].mxu0  ;;  %v568_v52 = vpop.f32.mrb[17].mxu1 }
 0x117   :  { %1091 = vst.msk [vmem:[%s2040_s3 + $0x2c] sm:$0xf] %vm1079_vm0, %v1264_v37  ;;  %1123 = vst.msk [vmem:[%s2040_s3 + $0xac] sm:$0xf] %vm1079_vm0, %v1296_v38  ;;  %v1294_v47 = vpack.c.bf16 %v800_v42, %v800_v42  ;;  %vm677_vm11 = vcmp.ge.f32.partialorder %v561_v44, 0.0  ;;  %v564_v55 = vadd.f32 %v1420_v26, %v1636_v40  ;;  %v1762_v56 = vpop.f32.mrb[18].mxu0  ;;  %v428_v7 = vadd.f32 %v1636_v40, %v427_v27 }
 0x118   :  { %1089 = vst.msk [vmem:[%s2040_s3 + $0x24] sm:$0xf] %vm1079_vm0, %v1262_v41  ;;  %v773_v53 = vsel %vm645_vm10, %v433_v20, %v709_v43  ;;  %v741_v54 = vmul.f32 0.2, %v561_v44  ;;  %v1764_v57 = vpop.f32.mrb[18].mxu1  ;;  %vm643_vm12 = vcmp.ge.f32.partialorder %v425_v48, 0.0  ;;  %v556_v11 = vadd.f32 %v1636_v40, %v555_v32 }
 0x119   :  { %1121 = vst.msk [vmem:[%s2040_s3 + $0xa4] sm:$0xf] %vm1079_vm0, %v1294_v47  ;;  %v1267_v58 = vpack.c.bf16 %v773_v53, %v773_v53  ;;  %v707_v59 = vmul.f32 0.2, %v425_v48  ;;  %vm675_vm13 = vcmp.ge.f32.partialorder %v553_v49, 0.0  ;;  %v1770_v60 = vpop.f32.mrb[19].mxu0  ;;  %v449_v14 = vadd.f32 %v1391_v45, %v1636_v40 }
 0x11a   :  { %v1772_v61 = vpop.f32.mrb[19].mxu1  ;;  %v805_v62 = vsel %vm677_vm11, %v561_v44, %v741_v54  ;;  %v739_v63 = vmul.f32 0.2, %v553_v49  ;;  %vm646_vm14 = vcmp.ge.f32.partialorder %v436_v50, 0.0  ;;  %v710_v0 = vmul.f32 0.2, %v436_v50 }
 0x11b   :  { %1094 = vst.msk [vmem:[%s2040_s3 + $0x38] sm:$0xf] %vm1079_vm0, %v1267_v58  ;;  %v1299_v1 = vpack.c.bf16 %v805_v62, %v805_v62  ;;  %v771_v2 = vsel %vm643_vm12, %v425_v48, %v707_v59  ;;  %vm678_vm15 = vcmp.ge.f32.partialorder %v564_v55, 0.0  ;;  %v742_v3 = vmul.f32 0.2, %v564_v55 }
 0x11c   :  { %v1265_v4 = vpack.c.bf16 %v771_v2, %v771_v2  ;;  %v803_v5 = vsel %vm675_vm13, %v553_v49, %v739_v63  ;;  %v774_v6 = vsel %vm646_vm14, %v436_v50, %v710_v0  ;;  %vm644_vm1 = vcmp.ge.f32.partialorder %v428_v7, 0.0 }
 0x11d   :  { %1126 = vst.msk [vmem:[%s2040_s3 + $0xb8] sm:$0xf] %vm1079_vm0, %v1299_v1  ;;  %v1297_v8 = vpack.c.bf16 %v803_v5, %v803_v5  ;;  %v1268_v9 = vpack.c.bf16 %v774_v6, %v774_v6  ;;  %v806_v10 = vsel %vm678_vm15, %v564_v55, %v742_v3  ;;  %v708_v13 = vmul.f32 0.2, %v428_v7  ;;  %v1395_v15 = vpop.f32.mrb[20].mxu0  ;;  %v1427_v16 = vpop.f32.mrb[20].mxu1 }
 0x11e   :  { %1092 = vst.msk [vmem:[%s2040_s3 + $0x30] sm:$0xf] %vm1079_vm0, %v1265_v4  ;;  %v1300_v12 = vpack.c.bf16 %v806_v10, %v806_v10  ;;  %vm676_vm2 = vcmp.ge.f32.partialorder %v556_v11, 0.0  ;;  %v740_v17 = vmul.f32 0.2, %v556_v11  ;;  %v577_v18 = vadd.f32 %v1423_v46, %v1636_v40  ;;  %v456_v20 = vpop.f32.mrb[21].mxu0 }
 0x11f   :  { %1124 = vst.msk [vmem:[%s2040_s3 + $0xb0] sm:$0xf] %vm1079_vm0, %v1297_v8  ;;  %1095 = vst.msk [vmem:[%s2040_s3 + $0x3c] sm:$0xf] %vm1079_vm0, %v1268_v9  ;;  %v441_v19 = vadd.f32 %v1636_v40, %v440_v51  ;;  %v1799_v21 = vpop.f32.mrb[21].mxu1  ;;  %v772_v22 = vsel %vm644_vm1, %v428_v7, %v708_v13  ;;  %vm649_vm3 = vcmp.ge.f32.partialorder %v449_v14, 0.0  ;;  %v569_v24 = vadd.f32 %v1636_v40, %v568_v52 }
 0x120   :  { %1127 = vst.msk [vmem:[%s2040_s3 + $0xbc] sm:$0xf] %vm1079_vm0, %v1300_v12  ;;  %v713_v23 = vmul.f32 0.2, %v449_v14  ;;  %v1806_v25 = vpop.f32.mrb[22].mxu0  ;;  %v1808_v26 = vpop.f32.mrb[22].mxu1  ;;  %v1266_v27 = vpack.c.bf16 %v772_v22, %v772_v22  ;;  %v804_v28 = vsel %vm676_vm2, %v556_v11, %v740_v17  ;;  %v452_v41 = vadd.f32 %v1762_v56, %v1636_v40 }
 0x121   :  { %vm681_vm4 = vcmp.ge.f32.partialorder %v577_v18, 0.0  ;;  %v745_v29 = vmul.f32 0.2, %v577_v18  ;;  %v1810_v30 = vpop.f32.mrb[23].mxu0  ;;  %v1812_v31 = vpop.f32.mrb[23].mxu1  ;;  %v1298_v32 = vpack.c.bf16 %v804_v28, %v804_v28  ;;  %vm647_vm5 = vcmp.ge.f32.partialorder %v441_v19, 0.0 }
 0x122   :  { %v777_v33 = vsel %vm649_vm3, %v449_v14, %v713_v23  ;;  %v711_v34 = vmul.f32 0.2, %v441_v19  ;;  %1093 = vst.msk [vmem:[%s2040_s3 + $0x34] sm:$0xf] %vm1079_vm0, %v1266_v27  ;;  %vm679_vm6 = vcmp.ge.f32.partialorder %v569_v24, 0.0  ;;  %v580_v42 = vadd.f32 %v1764_v57, %v1636_v40 }
 0x123   :  { %v1271_v35 = vpack.c.bf16 %v777_v33, %v777_v33  ;;  %v809_v36 = vsel %vm681_vm4, %v577_v18, %v745_v29  ;;  %v743_v37 = vmul.f32 0.2, %v569_v24  ;;  %1125 = vst.msk [vmem:[%s2040_s3 + $0xb4] sm:$0xf] %vm1079_vm0, %v1298_v32  ;;  %v444_v45 = vadd.f32 %v1636_v40, %v1770_v60 }
 0x124   :  { %v1303_v38 = vpack.c.bf16 %v809_v36, %v809_v36  ;;  %v775_v39 = vsel %vm647_vm5, %v441_v19, %v711_v34  ;;  %v572_v46 = vadd.f32 %v1636_v40, %v1772_v61  ;;  %vm650_vm7 = vcmp.ge.f32.partialorder %v452_v41, 0.0 }
 0x125   :  { %1098 = vst.msk [vmem:[%s2040_s3 + $0x48] sm:$0xf] %vm1079_vm0, %v1271_v35  ;;  %v1269_v43 = vpack.c.bf16 %v775_v39, %v775_v39  ;;  %v807_v44 = vsel %vm679_vm6, %v569_v24, %v743_v37  ;;  %v714_v48 = vmul.f32 0.2, %v452_v41  ;;  %vm682_vm8 = vcmp.ge.f32.partialorder %v580_v42, 0.0  ;;  %v1838_v49 = vpop.f32.mrb[24].mxu0 }
 0x126   :  { %1130 = vst.msk [vmem:[%s2040_s3 + $0xc8] sm:$0xf] %vm1079_vm0, %v1303_v38  ;;  %v1301_v47 = vpack.c.bf16 %v807_v44, %v807_v44  ;;  %v1840_v50 = vpop.f32.mrb[24].mxu1  ;;  %v746_v51 = vmul.f32 0.2, %v580_v42  ;;  %vm648_vm9 = vcmp.ge.f32.partialorder %v444_v45, 0.0  ;;  %v465_v55 = vadd.f32 %v1395_v15, %v1636_v40 }
 0x127   :  { %1096 = vst.msk [vmem:[%s2040_s3 + $0x40] sm:$0xf] %vm1079_vm0, %v1269_v43  ;;  %v712_v52 = vmul.f32 0.2, %v444_v45  ;;  %vm680_vm10 = vcmp.ge.f32.partialorder %v572_v46, 0.0  ;;  %v778_v53 = vsel %vm650_vm7, %v452_v41, %v714_v48  ;;  %v593_v56 = vadd.f32 %v1427_v16, %v1636_v40  ;;  %v1852_v57 = vpop.f32.mrb[25].mxu0 }
 0x128   :  { %1128 = vst.msk [vmem:[%s2040_s3 + $0xc0] sm:$0xf] %vm1079_vm0, %v1301_v47  ;;  %v744_v54 = vmul.f32 0.2, %v572_v46  ;;  %v1854_v58 = vpop.f32.mrb[25].mxu1  ;;  %v1272_v59 = vpack.c.bf16 %v778_v53, %v778_v53  ;;  %v810_v60 = vsel %vm682_vm8, %v580_v42, %v746_v51  ;;  %v457_v62 = vadd.f32 %v1636_v40, %v456_v20  ;;  %v1858_v63 = vpop.f32.mrb[26].mxu0 }
 0x129   :  { %v776_v61 = vsel %vm648_vm9, %v444_v45, %v712_v52  ;;  %v1860_v0 = vpop.f32.mrb[26].mxu1  ;;  %v1304_v1 = vpack.c.bf16 %v810_v60, %v810_v60  ;;  %vm653_vm11 = vcmp.ge.f32.partialorder %v465_v55, 0.0  ;;  %v1863_v4 = vpop.f32.mrb[27].mxu0  ;;  %v717_v7 = vmul.f32 0.2, %v465_v55 }
 0x12a   :  { %v1270_v2 = vpack.c.bf16 %v776_v61, %v776_v61  ;;  %v808_v3 = vsel %vm680_vm10, %v572_v46, %v744_v54  ;;  %v1865_v5 = vpop.f32.mrb[27].mxu1  ;;  %1099 = vst.msk [vmem:[%s2040_s3 + $0x4c] sm:$0xf] %vm1079_vm0, %v1272_v59  ;;  %vm685_vm12 = vcmp.ge.f32.partialorder %v593_v56, 0.0  ;;  %v749_v8 = vmul.f32 0.2, %v593_v56 }
 0x12b   :  { %v1302_v6 = vpack.c.bf16 %v808_v3, %v808_v3  ;;  %1131 = vst.msk [vmem:[%s2040_s3 + $0xcc] sm:$0xf] %vm1079_vm0, %v1304_v1  ;;  %vm651_vm13 = vcmp.ge.f32.partialorder %v457_v62, 0.0  ;;  %v715_v9 = vmul.f32 0.2, %v457_v62  ;;  %v585_v10 = vadd.f32 %v1636_v40, %v1799_v21 }
 0x12c   :  { %1097 = vst.msk [vmem:[%s2040_s3 + $0x44] sm:$0xf] %vm1079_vm0, %v1270_v2  ;;  %v468_v11 = vadd.f32 %v1806_v25, %v1636_v40  ;;  %v781_v12 = vsel %vm653_vm11, %v465_v55, %v717_v7  ;;  %v813_v13 = vsel %vm685_vm12, %v593_v56, %v749_v8  ;;  %v596_v14 = vadd.f32 %v1808_v26, %v1636_v40 }
 0x12d   :  { %1129 = vst.msk [vmem:[%s2040_s3 + $0xc4] sm:$0xf] %vm1079_vm0, %v1302_v6  ;;  %v460_v15 = vadd.f32 %v1636_v40, %v1810_v30  ;;  %v1275_v16 = vpack.c.bf16 %v781_v12, %v781_v12  ;;  %v1307_v17 = vpack.c.bf16 %v813_v13, %v813_v13  ;;  %v779_v18 = vsel %vm651_vm13, %v457_v62, %v715_v9  ;;  %v1891_v19 = vpop.f32.mrb[28].mxu0  ;;  %v1893_v20 = vpop.f32.mrb[28].mxu1 }
 0x12e   :  { %vm683_vm14 = vcmp.ge.f32.partialorder %v585_v10, 0.0  ;;  %v1273_v21 = vpack.c.bf16 %v779_v18, %v779_v18  ;;  %v747_v22 = vmul.f32 0.2, %v585_v10  ;;  %vm654_vm15 = vcmp.ge.f32.partialorder %v468_v11, 0.0  ;;  %v1895_v24 = vpop.f32.mrb[29].mxu0  ;;  %v1913_v32 = vpop.f32.mrb[29].mxu1 }
 0x12f   :  { %v718_v23 = vmul.f32 0.2, %v468_v11  ;;  %1102 = vst.msk [vmem:[%s2040_s3 + $0x58] sm:$0xf] %vm1079_vm0, %v1275_v16  ;;  %1134 = vst.msk [vmem:[%s2040_s3 + $0xd8] sm:$0xf] %vm1079_vm0, %v1307_v17  ;;  %v588_v29 = vadd.f32 %v1636_v40, %v1812_v31  ;;  %v481_v30 = vadd.f32 %v1838_v49, %v1636_v40  ;;  %v609_v45 = vadd.f32 %v1840_v50, %v1636_v40 }
 0x130   :  { %vm686_vm1 = vcmp.ge.f32.partialorder %v596_v14, 0.0  ;;  %v750_v25 = vmul.f32 0.2, %v596_v14  ;;  %vm652_vm2 = vcmp.ge.f32.partialorder %v460_v15, 0.0  ;;  %v716_v26 = vmul.f32 0.2, %v460_v15 }
 0x131   :  { %1100 = vst.msk [vmem:[%s2040_s3 + $0x50] sm:$0xf] %vm1079_vm0, %v1273_v21  ;;  %v811_v27 = vsel %vm683_vm14, %v585_v10, %v747_v22  ;;  %v782_v28 = vsel %vm654_vm15, %v468_v11, %v718_v23  ;;  %v1915_v33 = vpop.f32.mrb[30].mxu0  ;;  %v1917_v38 = vpop.f32.mrb[30].mxu1  ;;  %vm684_vm3 = vcmp.ge.f32.partialorder %v588_v29, 0.0  ;;  %vm657_vm4 = vcmp.ge.f32.partialorder %v481_v30, 0.0 }
 0x132   :  { %v1305_v34 = vpack.c.bf16 %v811_v27, %v811_v27  ;;  %v1276_v35 = vpack.c.bf16 %v782_v28, %v782_v28  ;;  %v814_v36 = vsel %vm686_vm1, %v596_v14, %v750_v25  ;;  %v780_v37 = vsel %vm652_vm2, %v460_v15, %v716_v26  ;;  %v1919_v39 = vpop.f32.mrb[31].mxu0  ;;  %v1921_v31 = vpop.f32.mrb[31].mxu1 }
 0x133   :  { %v1308_v41 = vpack.c.bf16 %v814_v36, %v814_v36  ;;  %v1274_v42 = vpack.c.bf16 %v780_v37, %v780_v37  ;;  %v748_v43 = vmul.f32 0.2, %v588_v29  ;;  %v721_v44 = vmul.f32 0.2, %v481_v30 }
 0x134   :  { %1132 = vst.msk [vmem:[%s2040_s3 + $0xd0] sm:$0xf] %vm1079_vm0, %v1305_v34  ;;  %1103 = vst.msk [vmem:[%s2040_s3 + $0x5c] sm:$0xf] %vm1079_vm0, %v1276_v35  ;;  %v473_v46 = vadd.f32 %v1636_v40, %v1852_v57  ;;  %v601_v48 = vadd.f32 %v1636_v40, %v1854_v58  ;;  %v484_v49 = vadd.f32 %v1858_v63, %v1636_v40  ;;  %vm689_vm5 = vcmp.ge.f32.partialorder %v609_v45, 0.0 }
 0x135   :  { %1135 = vst.msk [vmem:[%s2040_s3 + $0xdc] sm:$0xf] %vm1079_vm0, %v1308_v41  ;;  %1101 = vst.msk [vmem:[%s2040_s3 + $0x54] sm:$0xf] %vm1079_vm0, %v1274_v42  ;;  %v812_v47 = vsel %vm684_vm3, %v588_v29, %v748_v43  ;;  %v612_v50 = vadd.f32 %v1860_v0, %v1636_v40  ;;  %v785_v52 = vsel %vm657_vm4, %v481_v30, %v721_v44  ;;  %v753_v53 = vmul.f32 0.2, %v609_v45 }
 0x136   :  { %v1306_v51 = vpack.c.bf16 %v812_v47, %v812_v47  ;;  %v1279_v54 = vpack.c.bf16 %v785_v52, %v785_v52  ;;  %vm655_vm6 = vcmp.ge.f32.partialorder %v473_v46, 0.0  ;;  %v719_v55 = vmul.f32 0.2, %v473_v46 }
 0x137   :  { %vm687_vm7 = vcmp.ge.f32.partialorder %v601_v48, 0.0  ;;  %v817_v56 = vsel %vm689_vm5, %v609_v45, %v753_v53  ;;  %v751_v57 = vmul.f32 0.2, %v601_v48  ;;  %vm658_vm8 = vcmp.ge.f32.partialorder %v484_v49, 0.0 }
 0x138   :  { %1133 = vst.msk [vmem:[%s2040_s3 + $0xd4] sm:$0xf] %vm1079_vm0, %v1306_v51  ;;  %v722_v58 = vmul.f32 0.2, %v484_v49  ;;  %1106 = vst.msk [vmem:[%s2040_s3 + $0x68] sm:$0xf] %vm1079_vm0, %v1279_v54  ;;  %v1311_v59 = vpack.c.bf16 %v817_v56, %v817_v56  ;;  %v783_v60 = vsel %vm655_vm6, %v473_v46, %v719_v55  ;;  %v476_v1 = vadd.f32 %v1636_v40, %v1863_v4 }
 0x139   :  { %vm690_vm9 = vcmp.ge.f32.partialorder %v612_v50, 0.0  ;;  %v754_v61 = vmul.f32 0.2, %v612_v50  ;;  %v1277_v62 = vpack.c.bf16 %v783_v60, %v783_v60  ;;  %v815_v63 = vsel %vm687_vm7, %v601_v48, %v751_v57 }
 0x13a   :  { %v786_v0 = vsel %vm658_vm8, %v484_v49, %v722_v58  ;;  %1138 = vst.msk [vmem:[%s2040_s3 + $0xe8] sm:$0xf] %vm1079_vm0, %v1311_v59  ;;  %v1309_v2 = vpack.c.bf16 %v815_v63, %v815_v63  ;;  %v604_v7 = vadd.f32 %v1636_v40, %v1865_v5  ;;  %vm656_vm10 = vcmp.ge.f32.partialorder %v476_v1, 0.0 }
 0x13b   :  { %v1280_v3 = vpack.c.bf16 %v786_v0, %v786_v0  ;;  %v818_v6 = vsel %vm690_vm9, %v612_v50, %v754_v61  ;;  %1104 = vst.msk [vmem:[%s2040_s3 + $0x60] sm:$0xf] %vm1079_vm0, %v1277_v62  ;;  %v720_v9 = vmul.f32 0.2, %v476_v1  ;;  %v497_v4 = vadd.f32 %v1891_v19, %v1636_v40 }
 0x13c   :  { %v1312_v8 = vpack.c.bf16 %v818_v6, %v818_v6  ;;  %1136 = vst.msk [vmem:[%s2040_s3 + $0xe0] sm:$0xf] %vm1079_vm0, %v1309_v2  ;;  %vm688_vm11 = vcmp.ge.f32.partialorder %v604_v7, 0.0  ;;  %v752_v5 = vmul.f32 0.2, %v604_v7  ;;  %v625_v10 = vadd.f32 %v1893_v20, %v1636_v40 }
 0x13d   :  { %1107 = vst.msk [vmem:[%s2040_s3 + $0x6c] sm:$0xf] %vm1079_vm0, %v1280_v3  ;;  %v489_v11 = vadd.f32 %v1636_v40, %v1895_v24  ;;  %v784_v12 = vsel %vm656_vm10, %v476_v1, %v720_v9  ;;  %vm661_vm12 = vcmp.ge.f32.partialorder %v497_v4, 0.0  ;;  %v725_v13 = vmul.f32 0.2, %v497_v4 }
 0x13e   :  { %1139 = vst.msk [vmem:[%s2040_s3 + $0xec] sm:$0xf] %vm1079_vm0, %v1312_v8  ;;  %v617_v14 = vadd.f32 %v1636_v40, %v1913_v32  ;;  %v1278_v15 = vpack.c.bf16 %v784_v12, %v784_v12  ;;  %v816_v16 = vsel %vm688_vm11, %v604_v7, %v752_v5  ;;  %vm693_vm13 = vcmp.ge.f32.partialorder %v625_v10, 0.0 }
 0x13f   :  { %v757_v17 = vmul.f32 0.2, %v625_v10  ;;  %v1310_v18 = vpack.c.bf16 %v816_v16, %v816_v16  ;;  %v789_v19 = vsel %vm661_vm12, %v497_v4, %v725_v13  ;;  %vm659_vm14 = vcmp.ge.f32.partialorder %v489_v11, 0.0 }
 0x140   :  { %v723_v20 = vmul.f32 0.2, %v489_v11  ;;  %1105 = vst.msk [vmem:[%s2040_s3 + $0x64] sm:$0xf] %vm1079_vm0, %v1278_v15  ;;  %v1283_v21 = vpack.c.bf16 %v789_v19, %v789_v19  ;;  %vm691_vm15 = vcmp.ge.f32.partialorder %v617_v14, 0.0  ;;  %v500_v26 = vadd.f32 %v1915_v33, %v1636_v40 }
 0x141   :  { %v821_v22 = vsel %vm693_vm13, %v625_v10, %v757_v17  ;;  %v755_v23 = vmul.f32 0.2, %v617_v14  ;;  %1137 = vst.msk [vmem:[%s2040_s3 + $0xe4] sm:$0xf] %vm1079_vm0, %v1310_v18  ;;  %v628_v27 = vadd.f32 %v1917_v38, %v1636_v40  ;;  %v492_v30 = vadd.f32 %v1636_v40, %v1919_v39 }
 0x142   :  { %v1315_v24 = vpack.c.bf16 %v821_v22, %v821_v22  ;;  %v787_v25 = vsel %vm659_vm14, %v489_v11, %v723_v20  ;;  %1110 = vst.msk [vmem:[%s2040_s3 + $0x78] sm:$0xf] %vm1079_vm0, %v1283_v21  ;;  %v620_v32 = vadd.f32 %v1636_v40, %v1921_v31  ;;  %vm662_vm1 = vcmp.ge.f32.partialorder %v500_v26, 0.0 }
 0x143   :  { %v1281_v28 = vpack.c.bf16 %v787_v25, %v787_v25  ;;  %v819_v29 = vsel %vm691_vm15, %v617_v14, %v755_v23  ;;  %v726_v34 = vmul.f32 0.2, %v500_v26  ;;  %vm694_vm2 = vcmp.ge.f32.partialorder %v628_v27, 0.0 }
 0x144   :  { %1142 = vst.msk [vmem:[%s2040_s3 + $0xf8] sm:$0xf] %vm1079_vm0, %v1315_v24  ;;  %v1313_v33 = vpack.c.bf16 %v819_v29, %v819_v29  ;;  %v758_v35 = vmul.f32 0.2, %v628_v27  ;;  %vm660_vm3 = vcmp.ge.f32.partialorder %v492_v30, 0.0  ;;  %vm692_vm4 = vcmp.ge.f32.partialorder %v620_v32, 0.0 }
 0x145   :  { %1108 = vst.msk [vmem:[%s2040_s3 + $0x70] sm:$0xf] %vm1079_vm0, %v1281_v28  ;;  %v724_v36 = vmul.f32 0.2, %v492_v30  ;;  %v790_v40 = vsel %vm662_vm1, %v500_v26, %v726_v34  ;;  %v756_v37 = vmul.f32 0.2, %v620_v32 }
 0x146   :  { %1140 = vst.msk [vmem:[%s2040_s3 + $0xf0] sm:$0xf] %vm1079_vm0, %v1313_v33  ;;  %v1284_v38 = vpack.c.bf16 %v790_v40, %v790_v40  ;;  %v822_v39 = vsel %vm694_vm2, %v628_v27, %v758_v35 }
 0x147   :  { %v788_v41 = vsel %vm660_vm3, %v492_v30, %v724_v36  ;;  %v1316_v42 = vpack.c.bf16 %v822_v39, %v822_v39  ;;  %v820_v31 = vsel %vm692_vm4, %v620_v32, %v756_v37 }
 0x148   :  { %v1282_v43 = vpack.c.bf16 %v788_v41, %v788_v41  ;;  %1111 = vst.msk [vmem:[%s2040_s3 + $0x7c] sm:$0xf] %vm1079_vm0, %v1284_v38  ;;  %v1314_v44 = vpack.c.bf16 %v820_v31, %v820_v31 }
 0x149   :  { %1143 = vst.msk [vmem:[%s2040_s3 + $0xfc] sm:$0xf] %vm1079_vm0, %v1316_v42 }
 0x14a   :  { %1109 = vst.msk [vmem:[%s2040_s3 + $0x74] sm:$0xf] %vm1079_vm0, %v1282_v43  ;;  %1141 = vst.msk [vmem:[%s2040_s3 + $0xf4] sm:$0xf] %vm1079_vm0, %v1314_v44 }

// kernel: discriminator_forward.4
= control target key start
LH: loop header
LB: loop body
LE: loop exit
PB: predicated region body
PF: predicated region fallthrough
CT: control target
= control target key end

     0   :  { %s2463_s1 = inlined_call_operand.vmem [shape: bf16[1024,128], index: 1, kind: input, shape index: {}]   ;;  %s2464_s0 = inlined_call_operand.vmem [shape: bf16[128,1024], index: 0, kind: input, shape index: {}]   ;;  %s2465_s2 = inlined_call_operand.vmem [shape: f32[1,128], index: 2, kind: input, shape index: {}]   ;;  %s2466_s3 = inlined_call_operand.vmem [shape: bf16[128,128], index: 3, kind: output, shape index: {}]  }
   0x1   :  { %v1902_v0 = vld [vmem:[%s2463_s1 + $0x40] sm:$0xff]   ;;  %v1906_v4 = vld [vmem:[%s2463_s1 + $0x48] sm:$0xff]   ;;  %v1910_v8 = vld [vmem:[%s2463_s1 + $0x50] sm:$0xff]  }
   0x2   :  { %v1903_v1 = vld [vmem:[%s2463_s1 + $0xc0] sm:$0xff]   ;;  %1646 = vmatprep.subr.bf16.mxu0 %v1902_v0  ;;  %v1907_v5 = vld [vmem:[%s2463_s1 + $0xc8] sm:$0xff]   ;;  %v1911_v9 = vld [vmem:[%s2463_s1 + $0xd0] sm:$0xff]  }
   0x3   :  { %v1904_v2 = vld [vmem:[%s2463_s1] sm:$0xff]   ;;  %1710 = vmatprep.subr.bf16.mxu1 %v1903_v1  ;;  %v1908_v6 = vld [vmem:[%s2463_s1 + $0x8] sm:$0xff]   ;;  %v1912_v10 = vld [vmem:[%s2463_s1 + $0x10] sm:$0xff]  }
   0x4   :  { %v1905_v3 = vld [vmem:[%s2463_s1 + $0x80] sm:$0xff]   ;;  %1647 = vmatpush3.bf16.msra.mxu0 %v1904_v2  ;;  %v1909_v7 = vld [vmem:[%s2463_s1 + $0x88] sm:$0xff]   ;;  %v1913_v11 = vld [vmem:[%s2463_s1 + $0x90] sm:$0xff]  }
   0x5   :  { %1711 = vmatpush3.bf16.msra.mxu1 %v1905_v3  ;;  %1648 = vmatprep.subr.bf16.mxu0 %v1906_v4  ;;  %v1914_v12 = vld [vmem:[%s2463_s1 + $0x58] sm:$0xff]   ;;  %v1918_v16 = vld [vmem:[%s2463_s1 + $0x60] sm:$0xff]   ;;  %v1922_v20 = vld [vmem:[%s2463_s1 + $0x68] sm:$0xff]  }
   0x6   :  { %1712 = vmatprep.subr.bf16.mxu1 %v1907_v5  ;;  %v1915_v13 = vld [vmem:[%s2463_s1 + $0xd8] sm:$0xff]   ;;  %v1919_v17 = vld [vmem:[%s2463_s1 + $0xe0] sm:$0xff]   ;;  %v1923_v21 = vld [vmem:[%s2463_s1 + $0xe8] sm:$0xff]  }
   0x7   :  { %v1916_v14 = vld [vmem:[%s2463_s1 + $0x18] sm:$0xff]   ;;  %v1920_v18 = vld [vmem:[%s2463_s1 + $0x20] sm:$0xff]   ;;  %v1924_v22 = vld [vmem:[%s2463_s1 + $0x28] sm:$0xff]  }
   0x8   :  { %1649 = vmatpush3.bf16.msra.mxu0 %v1908_v6  ;;  %v1917_v15 = vld [vmem:[%s2463_s1 + $0x98] sm:$0xff]   ;;  %v1921_v19 = vld [vmem:[%s2463_s1 + $0xa0] sm:$0xff]   ;;  %v1925_v23 = vld [vmem:[%s2463_s1 + $0xa8] sm:$0xff]  }
   0x9   :  { %1713 = vmatpush3.bf16.msra.mxu1 %v1909_v7  ;;  %1650 = vmatprep.subr.bf16.mxu0 %v1910_v8  ;;  %v1926_v24 = vld [vmem:[%s2463_s1 + $0x70] sm:$0xff]   ;;  %v1930_v28 = vld [vmem:[%s2463_s1 + $0x78] sm:$0xff]   ;;  %v15_v32 = vld [vmem:[%s2464_s0] sm:$0xff] }
   0xa   :  { %1714 = vmatprep.subr.bf16.mxu1 %v1911_v9  ;;  %v1927_v25 = vld [vmem:[%s2463_s1 + $0xf0] sm:$0xff]   ;;  %v1931_v29 = vld [vmem:[%s2463_s1 + $0xf8] sm:$0xff]   ;;  %v19_v33 = vld [vmem:[%s2464_s0 + $0x20] sm:$0xff] }
   0xb   :  { %v1928_v26 = vld [vmem:[%s2463_s1 + $0x30] sm:$0xff]   ;;  %v1932_v30 = vld [vmem:[%s2463_s1 + $0x38] sm:$0xff]   ;;  %v16_v34 = vld [vmem:[%s2464_s0 + $0x8] sm:$0xff]  ;;  %v1439_v35 = vcombine.low %v15_v32, %v19_v33  ;;  %v1440_v36 = vcombine.high %v15_v32, %v19_v33 }
   0xc   :  { %1651 = vmatpush3.bf16.msra.mxu0 %v1912_v10  ;;  %v1929_v27 = vld [vmem:[%s2463_s1 + $0xb0] sm:$0xff]   ;;  %v1933_v31 = vld [vmem:[%s2463_s1 + $0xb8] sm:$0xff]   ;;  %v20_v37 = vld [vmem:[%s2464_s0 + $0x28] sm:$0xff] }
   0xd   :  { %1715 = vmatpush3.bf16.msra.mxu1 %v1913_v11  ;;  %1652 = vmatprep.subr.bf16.mxu0 %v1914_v12  ;;  %v1441_v38 = vcombine.low %v16_v34, %v20_v37  ;;  %v1442_v39 = vcombine.high %v16_v34, %v20_v37  ;;  %v1934_v40 = vld [vmem:[%s2463_s1 + $0x140] sm:$0xff]   ;;  %v24_v47 = vld [vmem:[%s2464_s0 + $0x48] sm:$0xff]  ;;  %v1942_v62 = vld [vmem:[%s2463_s1 + $0x150] sm:$0xff]  }
   0xe   :  { %1716 = vmatprep.subr.bf16.mxu1 %v1915_v13  ;;  %950 = vmatprep.mubr.bf16.mxu0 %v1440_v36  ;;  %v1935_v41 = vld [vmem:[%s2463_s1 + $0x100] sm:$0xff]   ;;  %v28_v48 = vld [vmem:[%s2464_s0 + $0x68] sm:$0xff]  ;;  %v1943_v63 = vld [vmem:[%s2463_s1 + $0x110] sm:$0xff]  }
   0xf   :  { %1047 = vmatprep.mubr.bf16.mxu1 %v1442_v39  ;;  %v1936_v42 = vld [vmem:[%s2463_s1 + $0x1c0] sm:$0xff]   ;;  %v1450_v49 = vcombine.high %v24_v47, %v28_v48  ;;  %v1938_v50 = vld [vmem:[%s2463_s1 + $0x148] sm:$0xff]   ;;  %v1449_v53 = vcombine.low %v24_v47, %v28_v48  ;;  %v1944_v0 = vld [vmem:[%s2463_s1 + $0x1d0] sm:$0xff]  }
  0x10   :  { %1653 = vmatpush3.bf16.msra.mxu0 %v1916_v14  ;;  %v1937_v43 = vld [vmem:[%s2463_s1 + $0x180] sm:$0xff]   ;;  %v1939_v52 = vld [vmem:[%s2463_s1 + $0x108] sm:$0xff]   ;;  %v1945_v1 = vld [vmem:[%s2463_s1 + $0x190] sm:$0xff]  }
  0x11   :  { %1717 = vmatpush3.bf16.msra.mxu1 %v1917_v15  ;;  %1654 = vmatprep.subr.bf16.mxu0 %v1918_v16  ;;  %v23_v44 = vld [vmem:[%s2464_s0 + $0x40] sm:$0xff]  ;;  %v1940_v54 = vld [vmem:[%s2463_s1 + $0x1c8] sm:$0xff]   ;;  %v1946_v10 = vld [vmem:[%s2463_s1 + $0x158] sm:$0xff]  }
  0x12   :  { %1718 = vmatprep.subr.bf16.mxu1 %v1919_v17  ;;  %v27_v45 = vld [vmem:[%s2464_s0 + $0x60] sm:$0xff]  ;;  %v1941_v55 = vld [vmem:[%s2463_s1 + $0x188] sm:$0xff]   ;;  %v1947_v11 = vld [vmem:[%s2463_s1 + $0x118] sm:$0xff]  }
  0x13   :  { %v1448_v46 = vcombine.high %v23_v44, %v27_v45  ;;  %v1447_v51 = vcombine.low %v23_v44, %v27_v45  ;;  %v31_v56 = vld [vmem:[%s2464_s0 + $0x80] sm:$0xff]  ;;  %v32_v58 = vld [vmem:[%s2464_s0 + $0x88] sm:$0xff]  ;;  %v1948_v12 = vld [vmem:[%s2463_s1 + $0x1d8] sm:$0xff]  }
  0x14   :  { %1655 = vmatpush3.bf16.msra.mxu0 %v1920_v18  ;;  %v35_v57 = vld [vmem:[%s2464_s0 + $0xa0] sm:$0xff]  ;;  %v36_v59 = vld [vmem:[%s2464_s0 + $0xa8] sm:$0xff]  ;;  %v1949_v13 = vld [vmem:[%s2463_s1 + $0x198] sm:$0xff]  }
  0x15   :  { %1719 = vmatpush3.bf16.msra.mxu1 %v1921_v19  ;;  %1656 = vmatprep.subr.bf16.mxu0 %v1922_v20  ;;  %v1456_v60 = vcombine.high %v31_v56, %v35_v57  ;;  %v1458_v61 = vcombine.high %v32_v58, %v36_v59  ;;  %v1455_v2 = vcombine.low %v31_v56, %v35_v57  ;;  %v39_v3 = vld [vmem:[%s2464_s0 + $0xc0] sm:$0xff]  ;;  %v40_v5 = vld [vmem:[%s2464_s0 + $0xc8] sm:$0xff]  ;;  %v1959_v39 = vld [vmem:[%s2463_s1 + $0x130] sm:$0xff]  }
  0x16   :  { %1720 = vmatprep.subr.bf16.mxu1 %v1923_v21  ;;  %v43_v4 = vld [vmem:[%s2464_s0 + $0xe0] sm:$0xff]  ;;  %v1457_v6 = vcombine.low %v32_v58, %v36_v59  ;;  %v44_v8 = vld [vmem:[%s2464_s0 + $0xe8] sm:$0xff]  ;;  %v1963_v48 = vld [vmem:[%s2463_s1 + $0x138] sm:$0xff]  }
  0x17   :  { %v1464_v7 = vcombine.high %v39_v3, %v43_v4  ;;  %v1466_v9 = vcombine.high %v40_v5, %v44_v8  ;;  %v47_v14 = vld [vmem:[%s2464_s0 + $0x100] sm:$0xff]  ;;  %v48_v16 = vld [vmem:[%s2464_s0 + $0x108] sm:$0xff]  ;;  %v1463_v19 = vcombine.low %v39_v3, %v43_v4  ;;  %v1465_v21 = vcombine.low %v40_v5, %v44_v8  ;;  %v26_v8 = vld [vmem:[%s2464_s0 + $0x58] sm:$0xff] }
  0x18   :  { %1657 = vmatpush3.bf16.msra.mxu0 %v1924_v22  ;;  %v51_v15 = vld [vmem:[%s2464_s0 + $0x120] sm:$0xff]  ;;  %v52_v17 = vld [vmem:[%s2464_s0 + $0x128] sm:$0xff] }
  0x19   :  { %1721 = vmatpush3.bf16.msra.mxu1 %v1925_v23  ;;  %1658 = vmatprep.subr.bf16.mxu0 %v1926_v24  ;;  %v1950_v18 = vld [vmem:[%s2463_s1 + $0x160] sm:$0xff]   ;;  %v1472_v22 = vcombine.high %v47_v14, %v51_v15  ;;  %v1474_v24 = vcombine.high %v48_v16, %v52_v17  ;;  %v1956_v32 = vld [vmem:[%s2463_s1 + $0x1e8] sm:$0xff]   ;;  %v1471_v34 = vcombine.low %v47_v14, %v51_v15  ;;  %v33_v14 = vld [vmem:[%s2464_s0 + $0x90] sm:$0xff] }
  0x1a   :  { %1722 = vmatprep.subr.bf16.mxu1 %v1927_v25  ;;  %v1951_v20 = vld [vmem:[%s2463_s1 + $0x120] sm:$0xff]   ;;  %v1957_v33 = vld [vmem:[%s2463_s1 + $0x1a8] sm:$0xff]   ;;  %v37_v15 = vld [vmem:[%s2464_s0 + $0xb0] sm:$0xff] }
  0x1b   :  { %v1952_v23 = vld [vmem:[%s2463_s1 + $0x1e0] sm:$0xff]   ;;  %v64_v44 = vld [vmem:[%s2464_s0 + $0x188] sm:$0xff] }
  0x1c   :  { %1659 = vmatpush3.bf16.msra.mxu0 %v1928_v26  ;;  %v1953_v25 = vld [vmem:[%s2463_s1 + $0x1a0] sm:$0xff]   ;;  %v68_v45 = vld [vmem:[%s2464_s0 + $0x1a8] sm:$0xff] }
  0x1d   :  { %1723 = vmatpush3.bf16.msra.mxu1 %v1929_v27  ;;  %1660 = vmatprep.subr.bf16.mxu0 %v1930_v28  ;;  %v55_v26 = vld [vmem:[%s2464_s0 + $0x140] sm:$0xff]  ;;  %v1954_v28 = vld [vmem:[%s2463_s1 + $0x168] sm:$0xff]   ;;  %v1489_v59 = vcombine.low %v64_v44, %v68_v45 }
  0x1e   :  { %1724 = vmatprep.subr.bf16.mxu1 %v1931_v29  ;;  %v59_v27 = vld [vmem:[%s2464_s0 + $0x160] sm:$0xff]  ;;  %v56_v29 = vld [vmem:[%s2464_s0 + $0x148] sm:$0xff] }
  0x1f   :  { %v1480_v36 = vcombine.high %v55_v26, %v59_v27  ;;  %v1479_v47 = vcombine.low %v55_v26, %v59_v27  ;;  %v72_v56 = vld [vmem:[%s2464_s0 + $0x1c8] sm:$0xff]  ;;  %v1459_v26 = vcombine.low %v33_v14, %v37_v15 }
  0x20   :  { %1661 = vmatpush3.bf16.msra.mxu0 %v1932_v30  ;;  %v60_v30 = vld [vmem:[%s2464_s0 + $0x168] sm:$0xff] }
  0x21   :  { %1725 = vmatpush3.bf16.msra.mxu1 %v1933_v31  ;;  %1774 = vmatprep.subr.bf16.mxu0 %v1934_v40  ;;  %v1955_v31 = vld [vmem:[%s2463_s1 + $0x128] sm:$0xff]   ;;  %v1482_v37 = vcombine.high %v56_v29, %v60_v30  ;;  %v1960_v40 = vld [vmem:[%s2463_s1 + $0x1f0] sm:$0xff]  }
  0x22   :  { %1838 = vmatprep.subr.bf16.mxu1 %v1936_v42  ;;  %v67_v42 = vld [vmem:[%s2464_s0 + $0x1a0] sm:$0xff]  ;;  %v76_v57 = vld [vmem:[%s2464_s0 + $0x1e8] sm:$0xff] }
  0x23   :  { %951 = vmatmul.mubr.bf16.vlgmr.msra.gmra.mrb[0].mxu0 %v1439_v35  ;;  %v1473_v35 = vcombine.low %v48_v16, %v52_v17  ;;  %v1497_v3 = vcombine.low %v72_v56, %v76_v57  ;;  %v34_v16 = vld [vmem:[%s2464_s0 + $0x98] sm:$0xff] }
  0x24   :  { %1048 = vmatmul.mubr.bf16.vlgmr.msra.gmra.mrb[0].mxu1 %v1441_v38  ;;  %1775 = vmatpush3.bf16.msra.mxu0 %v1935_v41  ;;  %v1958_v38 = vld [vmem:[%s2463_s1 + $0x170] sm:$0xff]   ;;  %v63_v41 = vld [vmem:[%s2464_s0 + $0x180] sm:$0xff]  ;;  %v38_v17 = vld [vmem:[%s2464_s0 + $0xb8] sm:$0xff] }
  0x25   :  { %1839 = vmatpush3.bf16.msra.mxu1 %v1937_v43  ;;  %958 = vmatprep.mubr.bf16.mxu0 %v1448_v46  ;;  %v1961_v43 = vld [vmem:[%s2463_s1 + $0x1b0] sm:$0xff]   ;;  %v1962_v46 = vld [vmem:[%s2463_s1 + $0x178] sm:$0xff]   ;;  %v1487_v58 = vcombine.low %v63_v41, %v67_v42  ;;  %v1461_v27 = vcombine.low %v34_v16, %v38_v17 }
  0x26   :  { %1055 = vmatprep.mubr.bf16.mxu1 %v1450_v49  ;;  %1776 = vmatprep.subr.bf16.mxu0 %v1938_v50  ;;  %v1481_v49 = vcombine.low %v56_v29, %v60_v30  ;;  %v1488_v50 = vcombine.high %v63_v41, %v67_v42  ;;  %v49_v30 = vld [vmem:[%s2464_s0 + $0x110] sm:$0xff]  ;;  %v62_v41 = vld [vmem:[%s2464_s0 + $0x178] sm:$0xff] }
  0x27   :  { %1840 = vmatprep.subr.bf16.mxu1 %v1940_v54  ;;  %v71_v54 = vld [vmem:[%s2464_s0 + $0x1c0] sm:$0xff] }
  0x28   :  { %1777 = vmatpush3.bf16.msra.mxu0 %v1939_v52  ;;  %v1490_v52 = vcombine.high %v64_v44, %v68_v45 }
  0x29   :  { %1841 = vmatpush3.bf16.msra.mxu1 %v1941_v55  ;;  %1778 = vmatprep.subr.bf16.mxu0 %v1942_v62  ;;  %v75_v55 = vld [vmem:[%s2464_s0 + $0x1e0] sm:$0xff]  ;;  %v17_v62 = vld [vmem:[%s2464_s0 + $0x10] sm:$0xff] }
  0x2a   :  { %1842 = vmatprep.subr.bf16.mxu1 %v1944_v0  ;;  %v18_v0 = vld [vmem:[%s2464_s0 + $0x18] sm:$0xff] }
  0x2b   :  { %959 = vmatmul.mubr.bf16.gmra.mrb[4].mxu0 %v1447_v51  ;;  %v1964_v51 = vld [vmem:[%s2463_s1 + $0x1f8] sm:$0xff]  }
  0x2c   :  { %1056 = vmatmul.mubr.bf16.gmra.mrb[4].mxu1 %v1449_v53  ;;  %966 = vmatprep.mubr.bf16.mxu0 %v1456_v60  ;;  %v1965_v53 = vld [vmem:[%s2463_s1 + $0x1b8] sm:$0xff]   ;;  %v1496_v60 = vcombine.high %v71_v54, %v75_v55 }
  0x2d   :  { %1063 = vmatprep.mubr.bf16.mxu1 %v1458_v61  ;;  %1779 = vmatpush3.bf16.msra.mxu0 %v1943_v63  ;;  %v1498_v61 = vcombine.high %v72_v56, %v76_v57  ;;  %v21_v63 = vld [vmem:[%s2464_s0 + $0x30] sm:$0xff]  ;;  %v74_v56 = vld [vmem:[%s2464_s0 + $0x1d8] sm:$0xff] }
  0x2e   :  { %1843 = vmatpush3.bf16.msra.mxu1 %v1945_v1  ;;  %1780 = vmatprep.subr.bf16.mxu0 %v1946_v10  ;;  %v22_v1 = vld [vmem:[%s2464_s0 + $0x38] sm:$0xff]  ;;  %v1444_v4 = vcombine.high %v17_v62, %v21_v63  ;;  %v1443_v10 = vcombine.low %v17_v62, %v21_v63 }
  0x2f   :  { %1844 = vmatprep.subr.bf16.mxu1 %v1948_v12  ;;  %v1446_v5 = vcombine.high %v18_v0, %v22_v1  ;;  %v78_v57 = vld [vmem:[%s2464_s0 + $0x1f8] sm:$0xff] }
  0x30   :  { %v1501_v63 = vcombine.low %v74_v56, %v78_v57 }
  0x31   :  { %1781 = vmatpush3.bf16.msra.mxu0 %v1947_v11  ;;  %v1445_v11 = vcombine.low %v18_v0, %v22_v1 }
  0x32   :  { %1845 = vmatpush3.bf16.msra.mxu1 %v1949_v13  ;;  %1782 = vmatprep.subr.bf16.mxu0 %v1950_v18 }
  0x33   :  { %967 = vmatmul.mubr.bf16.gmra.mrb[8].mxu0 %v1455_v2  ;;  %1846 = vmatprep.subr.bf16.mxu1 %v1952_v23  ;;  %v1495_v2 = vcombine.low %v71_v54, %v75_v55  ;;  %v45_v23 = vld [vmem:[%s2464_s0 + $0xf0] sm:$0xff] }
  0x34   :  { %1064 = vmatmul.mubr.bf16.gmra.mrb[8].mxu1 %v1457_v6  ;;  %974 = vmatprep.mubr.bf16.mxu0 %v1464_v7  ;;  %v25_v6 = vld [vmem:[%s2464_s0 + $0x50] sm:$0xff] }
  0x35   :  { %1071 = vmatprep.mubr.bf16.mxu1 %v1466_v9  ;;  %1783 = vmatpush3.bf16.msra.mxu0 %v1951_v20  ;;  %v29_v7 = vld [vmem:[%s2464_s0 + $0x70] sm:$0xff]  ;;  %v30_v9 = vld [vmem:[%s2464_s0 + $0x78] sm:$0xff]  ;;  %v1460_v20 = vcombine.high %v33_v14, %v37_v15 }
  0x36   :  { %1847 = vmatpush3.bf16.msra.mxu1 %v1953_v25  ;;  %1784 = vmatprep.subr.bf16.mxu0 %v1954_v28  ;;  %v1452_v12 = vcombine.high %v25_v6, %v29_v7  ;;  %v1454_v13 = vcombine.high %v26_v8, %v30_v9  ;;  %v1451_v18 = vcombine.low %v25_v6, %v29_v7  ;;  %v46_v25 = vld [vmem:[%s2464_s0 + $0xf8] sm:$0xff]  ;;  %v73_v54 = vld [vmem:[%s2464_s0 + $0x1d0] sm:$0xff] }
  0x37   :  { %1848 = vmatprep.subr.bf16.mxu1 %v1956_v32  ;;  %v50_v32 = vld [vmem:[%s2464_s0 + $0x118] sm:$0xff]  ;;  %v77_v55 = vld [vmem:[%s2464_s0 + $0x1f0] sm:$0xff] }
  0x38   :  { %v1499_v62 = vcombine.low %v73_v54, %v77_v55 }
  0x39   :  { %1785 = vmatpush3.bf16.msra.mxu0 %v1955_v31  ;;  %v53_v31 = vld [vmem:[%s2464_s0 + $0x130] sm:$0xff] }
  0x3a   :  { %1849 = vmatpush3.bf16.msra.mxu1 %v1957_v33  ;;  %1786 = vmatprep.subr.bf16.mxu0 %v1958_v38  ;;  %v54_v33 = vld [vmem:[%s2464_s0 + $0x138] sm:$0xff]  ;;  %v57_v38 = vld [vmem:[%s2464_s0 + $0x150] sm:$0xff]  ;;  %v1475_v42 = vcombine.low %v49_v30, %v53_v31 }
  0x3b   :  { %975 = vmatmul.mubr.bf16.gmra.mrb[12].mxu0 %v1463_v19  ;;  %1850 = vmatprep.subr.bf16.mxu1 %v1960_v40  ;;  %v1453_v19 = vcombine.low %v26_v8, %v30_v9  ;;  %v58_v40 = vld [vmem:[%s2464_s0 + $0x158] sm:$0xff] }
  0x3c   :  { %1072 = vmatmul.mubr.bf16.gmra.mrb[12].mxu1 %v1465_v21  ;;  %982 = vmatprep.mubr.bf16.mxu0 %v1472_v22  ;;  %v1462_v21 = vcombine.high %v34_v16, %v38_v17  ;;  %v41_v22 = vld [vmem:[%s2464_s0 + $0xd0] sm:$0xff]  ;;  %v1486_v45 = vcombine.high %v58_v40, %v62_v41 }
  0x3d   :  { %1079 = vmatprep.mubr.bf16.mxu1 %v1474_v24  ;;  %1787 = vmatpush3.bf16.msra.mxu0 %v1959_v39  ;;  %v42_v24 = vld [vmem:[%s2464_s0 + $0xd8] sm:$0xff]  ;;  %v1468_v28 = vcombine.high %v41_v22, %v45_v23  ;;  %v61_v39 = vld [vmem:[%s2464_s0 + $0x170] sm:$0xff] }
  0x3e   :  { %1851 = vmatpush3.bf16.msra.mxu1 %v1961_v43  ;;  %1788 = vmatprep.subr.bf16.mxu0 %v1962_v46  ;;  %v1470_v29 = vcombine.high %v42_v24, %v46_v25  ;;  %v1477_v43 = vcombine.low %v50_v32, %v54_v33  ;;  %v1484_v44 = vcombine.high %v57_v38, %v61_v39  ;;  %v65_v46 = vld [vmem:[%s2464_s0 + $0x190] sm:$0xff] }
  0x3f   :  { %1852 = vmatprep.subr.bf16.mxu1 %v1964_v51  ;;  %v1485_v51 = vcombine.low %v58_v40, %v62_v41 }
  0x41   :  { %1789 = vmatpush3.bf16.msra.mxu0 %v1963_v48  ;;  %v66_v48 = vld [vmem:[%s2464_s0 + $0x198] sm:$0xff] }
  0x42   :  { %1853 = vmatpush3.bf16.msra.mxu1 %v1965_v53 }
  0x43   :  { %983 = vmatmul.mubr.bf16.gmra.mrb[16].mxu0 %v1471_v34  ;;  %v1467_v34 = vcombine.low %v41_v22, %v45_v23 }
  0x44   :  { %1080 = vmatmul.mubr.bf16.gmra.mrb[16].mxu1 %v1473_v35  ;;  %990 = vmatprep.mubr.bf16.mxu0 %v1480_v36  ;;  %v1469_v35 = vcombine.low %v42_v24, %v46_v25  ;;  %v1476_v36 = vcombine.high %v49_v30, %v53_v31 }
  0x45   :  { %1087 = vmatprep.mubr.bf16.mxu1 %v1482_v37  ;;  %v1478_v37 = vcombine.high %v50_v32, %v54_v33 }
  0x4b   :  { %991 = vmatmul.mubr.bf16.gmra.mrb[20].mxu0 %v1479_v47  ;;  %v69_v47 = vld [vmem:[%s2464_s0 + $0x1b0] sm:$0xff] }
  0x4c   :  { %1088 = vmatmul.mubr.bf16.gmra.mrb[20].mxu1 %v1481_v49  ;;  %998 = vmatprep.mubr.bf16.mxu0 %v1488_v50  ;;  %v70_v49 = vld [vmem:[%s2464_s0 + $0x1b8] sm:$0xff]  ;;  %v1483_v50 = vcombine.low %v57_v38, %v61_v39 }
  0x4d   :  { %1095 = vmatprep.mubr.bf16.mxu1 %v1490_v52  ;;  %v1492_v52 = vcombine.high %v65_v46, %v69_v47  ;;  %v1494_v53 = vcombine.high %v66_v48, %v70_v49 }
  0x53   :  { %999 = vmatmul.mubr.bf16.gmra.mrb[24].mxu0 %v1487_v58  ;;  %v1491_v58 = vcombine.low %v65_v46, %v69_v47 }
  0x54   :  { %1096 = vmatmul.mubr.bf16.gmra.mrb[24].mxu1 %v1489_v59  ;;  %1006 = vmatprep.mubr.bf16.mxu0 %v1496_v60  ;;  %v1493_v59 = vcombine.low %v66_v48, %v70_v49  ;;  %v1500_v60 = vcombine.high %v73_v54, %v77_v55 }
  0x55   :  { %1103 = vmatprep.mubr.bf16.mxu1 %v1498_v61  ;;  %v1502_v61 = vcombine.high %v74_v56, %v78_v57 }
  0x5b   :  { %1007 = vmatmul.mubr.bf16.gmra.mrb[28].mxu0 %v1495_v2  ;;  %v2373_v2 = vld [vmem:[%s2465_s2] ss:$0 sm:$0xff] }
  0x5c   :  { %1104 = vmatmul.mubr.bf16.gmra.mrb[28].mxu1 %v1497_v3  ;;  %1144 = vmatprep.mubr.bf16.mxu0 %v1444_v4 }
  0x5d   :  { %1241 = vmatprep.mubr.bf16.mxu1 %v1446_v5 }
  0x63   :  { %1145 = vmatmul.mubr.bf16.vlgmr.msra.gmra.mrb[32].mxu0 %v1443_v10 }
  0x64   :  { %1242 = vmatmul.mubr.bf16.vlgmr.msra.gmra.mrb[32].mxu1 %v1445_v11  ;;  %1152 = vmatprep.mubr.bf16.mxu0 %v1452_v12 }
  0x65   :  { %1249 = vmatprep.mubr.bf16.mxu1 %v1454_v13 }
  0x6b   :  { %1153 = vmatmul.mubr.bf16.gmra.mrb[36].mxu0 %v1451_v18 }
  0x6c   :  { %1250 = vmatmul.mubr.bf16.gmra.mrb[36].mxu1 %v1453_v19  ;;  %1160 = vmatprep.mubr.bf16.mxu0 %v1460_v20 }
  0x6d   :  { %1257 = vmatprep.mubr.bf16.mxu1 %v1462_v21 }
  0x73   :  { %1161 = vmatmul.mubr.bf16.gmra.mrb[40].mxu0 %v1459_v26 }
  0x74   :  { %1258 = vmatmul.mubr.bf16.gmra.mrb[40].mxu1 %v1461_v27  ;;  %1168 = vmatprep.mubr.bf16.mxu0 %v1468_v28 }
  0x75   :  { %1265 = vmatprep.mubr.bf16.mxu1 %v1470_v29 }
  0x7b   :  { %1169 = vmatmul.mubr.bf16.gmra.mrb[44].mxu0 %v1467_v34 }
  0x7c   :  { %1266 = vmatmul.mubr.bf16.gmra.mrb[44].mxu1 %v1469_v35  ;;  %1176 = vmatprep.mubr.bf16.mxu0 %v1476_v36 }
  0x7d   :  { %1273 = vmatprep.mubr.bf16.mxu1 %v1478_v37 }
  0x83   :  { %1177 = vmatmul.mubr.bf16.gmra.mrb[48].mxu0 %v1475_v42 }
  0x84   :  { %1274 = vmatmul.mubr.bf16.gmra.mrb[48].mxu1 %v1477_v43  ;;  %1184 = vmatprep.mubr.bf16.mxu0 %v1484_v44 }
  0x85   :  { %1281 = vmatprep.mubr.bf16.mxu1 %v1486_v45 }
  0x8b   :  { %1185 = vmatmul.mubr.bf16.gmra.mrb[52].mxu0 %v1483_v50 }
  0x8c   :  { %1282 = vmatmul.mubr.bf16.gmra.mrb[52].mxu1 %v1485_v51  ;;  %1192 = vmatprep.mubr.bf16.mxu0 %v1492_v52 }
  0x8d   :  { %1289 = vmatprep.mubr.bf16.mxu1 %v1494_v53 }
  0x93   :  { %1193 = vmatmul.mubr.bf16.gmra.mrb[56].mxu0 %v1491_v58 }
  0x94   :  { %1290 = vmatmul.mubr.bf16.gmra.mrb[56].mxu1 %v1493_v59  ;;  %1200 = vmatprep.mubr.bf16.mxu0 %v1500_v60 }
  0x95   :  { %1297 = vmatprep.mubr.bf16.mxu1 %v1502_v61 }
  0x9b   :  { %1201 = vmatmul.mubr.bf16.gmra.mrb[60].mxu0 %v1499_v62 }
  0x9c   :  { %1298 = vmatmul.mubr.bf16.gmra.mrb[60].mxu1 %v1501_v63 }
  0xf6   :  { %v1662_v0 = vpop.f32.mrb[0].mxu0 }
  0xf7   :  { %v1726_v1 = vpop.f32.mrb[0].mxu1  ;;  %v1663_v3 = vpop.f32.mrb[1].mxu0 }
  0xf8   :  { %v1664_v4 = vadd.f32 %v1663_v3, %v1662_v0  ;;  %v1727_v5 = vpop.f32.mrb[1].mxu1  ;;  %v1665_v6 = vpop.f32.mrb[2].mxu0 }
  0xf9   :  { %v1728_v7 = vadd.f32 %v1727_v5, %v1726_v1  ;;  %v1729_v8 = vpop.f32.mrb[2].mxu1  ;;  %v1666_v9 = vpop.f32.mrb[3].mxu0 }
  0xfa   :  { %v953_v10 = vadd.f32 %v1664_v4, %v2373_v2  ;;  %v1667_v11 = vadd.f32 %v1666_v9, %v1665_v6  ;;  %v1730_v12 = vpop.f32.mrb[3].mxu1 }
  0xfb   :  { %v1731_v13 = vadd.f32 %v1730_v12, %v1729_v8 }
  0xfc   :  { %v2376_v14 = vadd.f32 %v1728_v7, %v953_v10  ;;  %v956_v15 = vadd.f32 %v1667_v11, %v2373_v2 }
  0xfe   :  { %v2379_v16 = vadd.f32 %v1731_v13, %v956_v15  ;;  %v1668_v17 = vpop.f32.mrb[4].mxu0 }
  0xff   :  { %v1732_v18 = vpop.f32.mrb[4].mxu1  ;;  %v1669_v19 = vpop.f32.mrb[5].mxu0 }
 0x100   :  { %v1670_v20 = vadd.f32 %v1669_v19, %v1668_v17  ;;  %v1733_v21 = vpop.f32.mrb[5].mxu1  ;;  %v1671_v22 = vpop.f32.mrb[6].mxu0 }
 0x101   :  { %v1734_v23 = vadd.f32 %v1733_v21, %v1732_v18  ;;  %v1735_v24 = vpop.f32.mrb[6].mxu1  ;;  %v1672_v25 = vpop.f32.mrb[7].mxu0 }
 0x102   :  { %v961_v26 = vadd.f32 %v1670_v20, %v2373_v2  ;;  %v1673_v27 = vadd.f32 %v1672_v25, %v1671_v22  ;;  %v1736_v28 = vpop.f32.mrb[7].mxu1 }
 0x103   :  { %v1737_v29 = vadd.f32 %v1736_v28, %v1735_v24 }
 0x104   :  { %v2382_v30 = vadd.f32 %v1734_v23, %v961_v26  ;;  %v964_v31 = vadd.f32 %v1673_v27, %v2373_v2 }
 0x106   :  { %v2385_v32 = vadd.f32 %v1737_v29, %v964_v31  ;;  %v1674_v33 = vpop.f32.mrb[8].mxu0 }
 0x107   :  { %v1738_v34 = vpop.f32.mrb[8].mxu1  ;;  %v1675_v35 = vpop.f32.mrb[9].mxu0 }
 0x108   :  { %v1676_v36 = vadd.f32 %v1675_v35, %v1674_v33  ;;  %v1739_v37 = vpop.f32.mrb[9].mxu1  ;;  %v1677_v38 = vpop.f32.mrb[10].mxu0 }
 0x109   :  { %v1740_v39 = vadd.f32 %v1739_v37, %v1738_v34  ;;  %v1741_v40 = vpop.f32.mrb[10].mxu1  ;;  %v1678_v41 = vpop.f32.mrb[11].mxu0 }
 0x10a   :  { %v969_v42 = vadd.f32 %v1676_v36, %v2373_v2  ;;  %v1679_v43 = vadd.f32 %v1678_v41, %v1677_v38  ;;  %v1742_v44 = vpop.f32.mrb[11].mxu1 }
 0x10b   :  { %v1743_v45 = vadd.f32 %v1742_v44, %v1741_v40 }
 0x10c   :  { %v2388_v46 = vadd.f32 %v1740_v39, %v969_v42  ;;  %v972_v47 = vadd.f32 %v1679_v43, %v2373_v2 }
 0x10e   :  { %v2391_v48 = vadd.f32 %v1743_v45, %v972_v47  ;;  %v1680_v49 = vpop.f32.mrb[12].mxu0 }
 0x10f   :  { %v1744_v50 = vpop.f32.mrb[12].mxu1  ;;  %v1681_v51 = vpop.f32.mrb[13].mxu0 }
 0x110   :  { %v1682_v52 = vadd.f32 %v1681_v51, %v1680_v49  ;;  %v1745_v53 = vpop.f32.mrb[13].mxu1  ;;  %v1683_v54 = vpop.f32.mrb[14].mxu0 }
 0x111   :  { %v1746_v55 = vadd.f32 %v1745_v53, %v1744_v50  ;;  %v1747_v56 = vpop.f32.mrb[14].mxu1  ;;  %v1684_v57 = vpop.f32.mrb[15].mxu0 }
 0x112   :  { %v977_v58 = vadd.f32 %v1682_v52, %v2373_v2  ;;  %v1685_v59 = vadd.f32 %v1684_v57, %v1683_v54  ;;  %v1748_v60 = vpop.f32.mrb[15].mxu1 }
 0x113   :  { %v1749_v61 = vadd.f32 %v1748_v60, %v1747_v56 }
 0x114   :  { %v2394_v62 = vadd.f32 %v1746_v55, %v977_v58  ;;  %v980_v63 = vadd.f32 %v1685_v59, %v2373_v2 }
 0x116   :  { %v2397_v0 = vadd.f32 %v1749_v61, %v980_v63  ;;  %v1686_v1 = vpop.f32.mrb[16].mxu0 }
 0x117   :  { %v1750_v3 = vpop.f32.mrb[16].mxu1  ;;  %v1687_v4 = vpop.f32.mrb[17].mxu0 }
 0x118   :  { %v1688_v5 = vadd.f32 %v1687_v4, %v1686_v1  ;;  %v1751_v6 = vpop.f32.mrb[17].mxu1  ;;  %v1689_v7 = vpop.f32.mrb[18].mxu0 }
 0x119   :  { %v1752_v8 = vadd.f32 %v1751_v6, %v1750_v3  ;;  %v1753_v9 = vpop.f32.mrb[18].mxu1  ;;  %v1690_v10 = vpop.f32.mrb[19].mxu0 }
 0x11a   :  { %v985_v11 = vadd.f32 %v1688_v5, %v2373_v2  ;;  %v1691_v12 = vadd.f32 %v1690_v10, %v1689_v7  ;;  %v1754_v13 = vpop.f32.mrb[19].mxu1 }
 0x11b   :  { %v1755_v15 = vadd.f32 %v1754_v13, %v1753_v9 }
 0x11c   :  { %v2400_v17 = vadd.f32 %v1752_v8, %v985_v11  ;;  %v988_v18 = vadd.f32 %v1691_v12, %v2373_v2 }
 0x11e   :  { %v2403_v19 = vadd.f32 %v1755_v15, %v988_v18  ;;  %v1692_v20 = vpop.f32.mrb[20].mxu0 }
 0x11f   :  { %v1756_v21 = vpop.f32.mrb[20].mxu1  ;;  %v1693_v22 = vpop.f32.mrb[21].mxu0 }
 0x120   :  { %v1694_v23 = vadd.f32 %v1693_v22, %v1692_v20  ;;  %v1757_v24 = vpop.f32.mrb[21].mxu1  ;;  %v1695_v25 = vpop.f32.mrb[22].mxu0 }
 0x121   :  { %v1758_v26 = vadd.f32 %v1757_v24, %v1756_v21  ;;  %v1759_v27 = vpop.f32.mrb[22].mxu1  ;;  %v1696_v28 = vpop.f32.mrb[23].mxu0 }
 0x122   :  { %v993_v29 = vadd.f32 %v1694_v23, %v2373_v2  ;;  %v1697_v31 = vadd.f32 %v1696_v28, %v1695_v25  ;;  %v1760_v33 = vpop.f32.mrb[23].mxu1 }
 0x123   :  { %v1761_v34 = vadd.f32 %v1760_v33, %v1759_v27 }
 0x124   :  { %v2406_v35 = vadd.f32 %v1758_v26, %v993_v29  ;;  %v996_v36 = vadd.f32 %v1697_v31, %v2373_v2 }
 0x126   :  { %v2409_v37 = vadd.f32 %v1761_v34, %v996_v36  ;;  %v1698_v38 = vpop.f32.mrb[24].mxu0 }
 0x127   :  { %v1762_v39 = vpop.f32.mrb[24].mxu1  ;;  %v1699_v40 = vpop.f32.mrb[25].mxu0 }
 0x128   :  { %v1700_v41 = vadd.f32 %v1699_v40, %v1698_v38  ;;  %v1763_v42 = vpop.f32.mrb[25].mxu1  ;;  %v1701_v43 = vpop.f32.mrb[26].mxu0 }
 0x129   :  { %v1764_v44 = vadd.f32 %v1763_v42, %v1762_v39  ;;  %v1765_v45 = vpop.f32.mrb[26].mxu1  ;;  %v1702_v47 = vpop.f32.mrb[27].mxu0 }
 0x12a   :  { %v1001_v49 = vadd.f32 %v1700_v41, %v2373_v2  ;;  %v1703_v50 = vadd.f32 %v1702_v47, %v1701_v43  ;;  %v1766_v51 = vpop.f32.mrb[27].mxu1 }
 0x12b   :  { %v1767_v52 = vadd.f32 %v1766_v51, %v1765_v45 }
 0x12c   :  { %v2412_v53 = vadd.f32 %v1764_v44, %v1001_v49  ;;  %v1004_v54 = vadd.f32 %v1703_v50, %v2373_v2 }
 0x12e   :  { %v2415_v55 = vadd.f32 %v1767_v52, %v1004_v54  ;;  %v1704_v56 = vpop.f32.mrb[28].mxu0 }
 0x12f   :  { %v1768_v57 = vpop.f32.mrb[28].mxu1  ;;  %v1705_v58 = vpop.f32.mrb[29].mxu0 }
 0x130   :  { %v1706_v59 = vadd.f32 %v1705_v58, %v1704_v56  ;;  %v1769_v60 = vpop.f32.mrb[29].mxu1  ;;  %v1707_v61 = vpop.f32.mrb[30].mxu0 }
 0x131   :  { %v1770_v63 = vadd.f32 %v1769_v60, %v1768_v57  ;;  %v1771_v1 = vpop.f32.mrb[30].mxu1  ;;  %v1708_v3 = vpop.f32.mrb[31].mxu0 }
 0x132   :  { %v1009_v4 = vadd.f32 %v1706_v59, %v2373_v2  ;;  %v1709_v5 = vadd.f32 %v1708_v3, %v1707_v61  ;;  %v1772_v6 = vpop.f32.mrb[31].mxu1 }
 0x133   :  { %v1773_v7 = vadd.f32 %v1772_v6, %v1771_v1 }
 0x134   :  { %v2418_v8 = vadd.f32 %v1770_v63, %v1009_v4  ;;  %v1012_v9 = vadd.f32 %v1709_v5, %v2373_v2 }
 0x136   :  { %v2421_v10 = vadd.f32 %v1773_v7, %v1012_v9  ;;  %v1790_v11 = vpop.f32.mrb[32].mxu0 }
 0x137   :  { %v1854_v12 = vpop.f32.mrb[32].mxu1  ;;  %v1791_v13 = vpop.f32.mrb[33].mxu0 }
 0x138   :  { %v1792_v15 = vadd.f32 %v1791_v13, %v1790_v11  ;;  %v1855_v18 = vpop.f32.mrb[33].mxu1  ;;  %v1793_v20 = vpop.f32.mrb[34].mxu0 }
 0x139   :  { %v1856_v21 = vadd.f32 %v1855_v18, %v1854_v12  ;;  %v1857_v22 = vpop.f32.mrb[34].mxu1  ;;  %v1794_v23 = vpop.f32.mrb[35].mxu0 }
 0x13a   :  { %v1147_v24 = vadd.f32 %v1792_v15, %v2376_v14  ;;  %v1795_v25 = vadd.f32 %v1794_v23, %v1793_v20  ;;  %v1858_v26 = vpop.f32.mrb[35].mxu1 }
 0x13b   :  { %v1859_v27 = vadd.f32 %v1858_v26, %v1857_v22 }
 0x13c   :  { %v1244_v28 = vadd.f32 %v1856_v21, %v1147_v24  ;;  %v1150_v29 = vadd.f32 %v1795_v25, %v2379_v16 }
 0x13e   :  { %v1322_v2 = vmul.f32 0.2, %v1244_v28  ;;  %v1247_v31 = vadd.f32 %v1859_v27, %v1150_v29  ;;  %v1796_v33 = vpop.f32.mrb[36].mxu0  ;;  %vm1306_vm0 = vcmp.ge.f32.partialorder %v1244_v28, 0.0 }
 0x13f   :  { %v1860_v34 = vpop.f32.mrb[36].mxu1  ;;  %v1797_v36 = vpop.f32.mrb[37].mxu0 }
 0x140   :  { %vm1307_vm1 = vcmp.ge.f32.partialorder %v1247_v31, 0.0  ;;  %v1323_v38 = vmul.f32 0.2, %v1247_v31  ;;  %v1798_v39 = vadd.f32 %v1797_v36, %v1796_v33  ;;  %v1861_v40 = vpop.f32.mrb[37].mxu1  ;;  %v1799_v41 = vpop.f32.mrb[38].mxu0  ;;  %v1338_v44 = vsel %vm1306_vm0, %v1244_v28, %v1322_v2 }
 0x141   :  { %v1862_v42 = vadd.f32 %v1861_v40, %v1860_v34  ;;  %v1863_v43 = vpop.f32.mrb[38].mxu1  ;;  %v1800_v14 = vpop.f32.mrb[39].mxu0 }
 0x142   :  { %v1339_v45 = vsel %vm1307_vm1, %v1247_v31, %v1323_v38  ;;  %v1155_v47 = vadd.f32 %v1798_v39, %v2382_v30  ;;  %v1801_v49 = vadd.f32 %v1800_v14, %v1799_v41  ;;  %v1864_v16 = vpop.f32.mrb[39].mxu1 }
 0x143   :  { %v1602_v50 = vpack.c.bf16 %v1339_v45, %v1338_v44  ;;  %v1865_v51 = vadd.f32 %v1864_v16, %v1863_v43 }
 0x144   :  { %v1252_v52 = vadd.f32 %v1862_v42, %v1155_v47  ;;  %v1158_v54 = vadd.f32 %v1801_v49, %v2385_v32 }
 0x145   :  { %1603 = vst [vmem:[%s2466_s3] sm:$0xff] %v1602_v50  }
 0x146   :  { %v1324_v56 = vmul.f32 0.2, %v1252_v52  ;;  %v1255_v57 = vadd.f32 %v1865_v51, %v1158_v54  ;;  %v1802_v58 = vpop.f32.mrb[40].mxu0  ;;  %vm1308_vm2 = vcmp.ge.f32.partialorder %v1252_v52, 0.0 }
 0x147   :  { %v1866_v59 = vpop.f32.mrb[40].mxu1  ;;  %v1803_v60 = vpop.f32.mrb[41].mxu0 }
 0x148   :  { %vm1309_vm3 = vcmp.ge.f32.partialorder %v1255_v57, 0.0  ;;  %v1325_v61 = vmul.f32 0.2, %v1255_v57  ;;  %v1804_v30 = vadd.f32 %v1803_v60, %v1802_v58  ;;  %v1867_v63 = vpop.f32.mrb[41].mxu1  ;;  %v1805_v1 = vpop.f32.mrb[42].mxu0  ;;  %v1340_v6 = vsel %vm1308_vm2, %v1252_v52, %v1324_v56 }
 0x149   :  { %v1868_v3 = vadd.f32 %v1867_v63, %v1866_v59  ;;  %v1869_v4 = vpop.f32.mrb[42].mxu1  ;;  %v1806_v5 = vpop.f32.mrb[43].mxu0 }
 0x14a   :  { %v1341_v32 = vsel %vm1309_vm3, %v1255_v57, %v1325_v61  ;;  %v1163_v7 = vadd.f32 %v1804_v30, %v2388_v46  ;;  %v1807_v9 = vadd.f32 %v1806_v5, %v1805_v1  ;;  %v1870_v11 = vpop.f32.mrb[43].mxu1 }
 0x14b   :  { %v1607_v12 = vpack.c.bf16 %v1341_v32, %v1340_v6  ;;  %v1871_v13 = vadd.f32 %v1870_v11, %v1869_v4 }
 0x14c   :  { %v1260_v15 = vadd.f32 %v1868_v3, %v1163_v7  ;;  %v1166_v18 = vadd.f32 %v1807_v9, %v2391_v48 }
 0x14d   :  { %1639 = vst [vmem:[%s2466_s3 + $0x8] sm:$0xff] %v1607_v12  }
 0x14e   :  { %v1326_v20 = vmul.f32 0.2, %v1260_v15  ;;  %v1263_v21 = vadd.f32 %v1871_v13, %v1166_v18  ;;  %v1808_v22 = vpop.f32.mrb[44].mxu0  ;;  %vm1310_vm4 = vcmp.ge.f32.partialorder %v1260_v15, 0.0 }
 0x14f   :  { %v1872_v23 = vpop.f32.mrb[44].mxu1  ;;  %v1809_v24 = vpop.f32.mrb[45].mxu0 }
 0x150   :  { %vm1311_vm5 = vcmp.ge.f32.partialorder %v1263_v21, 0.0  ;;  %v1327_v25 = vmul.f32 0.2, %v1263_v21  ;;  %v1810_v46 = vadd.f32 %v1809_v24, %v1808_v22  ;;  %v1873_v26 = vpop.f32.mrb[45].mxu1  ;;  %v1811_v27 = vpop.f32.mrb[46].mxu0  ;;  %v1342_v31 = vsel %vm1310_vm4, %v1260_v15, %v1326_v20 }
 0x151   :  { %v1874_v28 = vadd.f32 %v1873_v26, %v1872_v23  ;;  %v1875_v29 = vpop.f32.mrb[46].mxu1  ;;  %v1812_v2 = vpop.f32.mrb[47].mxu0 }
 0x152   :  { %v1343_v48 = vsel %vm1311_vm5, %v1263_v21, %v1327_v25  ;;  %v1171_v33 = vadd.f32 %v1810_v46, %v2394_v62  ;;  %v1813_v34 = vadd.f32 %v1812_v2, %v1811_v27  ;;  %v1876_v36 = vpop.f32.mrb[47].mxu1 }
 0x153   :  { %v1612_v38 = vpack.c.bf16 %v1343_v48, %v1342_v31  ;;  %v1877_v39 = vadd.f32 %v1876_v36, %v1875_v29 }
 0x154   :  { %v1268_v40 = vadd.f32 %v1874_v28, %v1171_v33  ;;  %v1174_v41 = vadd.f32 %v1813_v34, %v2397_v0 }
 0x155   :  { %1640 = vst [vmem:[%s2466_s3 + $0x10] sm:$0xff] %v1612_v38  }
 0x156   :  { %v1328_v42 = vmul.f32 0.2, %v1268_v40  ;;  %v1271_v43 = vadd.f32 %v1877_v39, %v1174_v41  ;;  %v1814_v14 = vpop.f32.mrb[48].mxu0  ;;  %vm1312_vm6 = vcmp.ge.f32.partialorder %v1268_v40, 0.0 }
 0x157   :  { %v1878_v44 = vpop.f32.mrb[48].mxu1  ;;  %v1815_v45 = vpop.f32.mrb[49].mxu0 }
 0x158   :  { %vm1313_vm7 = vcmp.ge.f32.partialorder %v1271_v43, 0.0  ;;  %v1329_v47 = vmul.f32 0.2, %v1271_v43  ;;  %v1816_v62 = vadd.f32 %v1815_v45, %v1814_v14  ;;  %v1879_v49 = vpop.f32.mrb[49].mxu1  ;;  %v1817_v16 = vpop.f32.mrb[50].mxu0  ;;  %v1344_v54 = vsel %vm1312_vm6, %v1268_v40, %v1328_v42 }
 0x159   :  { %v1880_v50 = vadd.f32 %v1879_v49, %v1878_v44  ;;  %v1881_v51 = vpop.f32.mrb[50].mxu1  ;;  %v1818_v52 = vpop.f32.mrb[51].mxu0 }
 0x15a   :  { %v1345_v0 = vsel %vm1313_vm7, %v1271_v43, %v1329_v47  ;;  %v1179_v56 = vadd.f32 %v1816_v62, %v2400_v17  ;;  %v1819_v57 = vadd.f32 %v1818_v52, %v1817_v16  ;;  %v1882_v58 = vpop.f32.mrb[51].mxu1 }
 0x15b   :  { %v1617_v59 = vpack.c.bf16 %v1345_v0, %v1344_v54  ;;  %v1883_v60 = vadd.f32 %v1882_v58, %v1881_v51 }
 0x15c   :  { %v1276_v61 = vadd.f32 %v1880_v50, %v1179_v56  ;;  %v1182_v30 = vadd.f32 %v1819_v57, %v2403_v19 }
 0x15d   :  { %1641 = vst [vmem:[%s2466_s3 + $0x18] sm:$0xff] %v1617_v59  }
 0x15e   :  { %v1330_v63 = vmul.f32 0.2, %v1276_v61  ;;  %v1279_v1 = vadd.f32 %v1883_v60, %v1182_v30  ;;  %v1820_v3 = vpop.f32.mrb[52].mxu0  ;;  %vm1314_vm8 = vcmp.ge.f32.partialorder %v1276_v61, 0.0 }
 0x15f   :  { %v1884_v4 = vpop.f32.mrb[52].mxu1  ;;  %v1821_v5 = vpop.f32.mrb[53].mxu0 }
 0x160   :  { %vm1315_vm9 = vcmp.ge.f32.partialorder %v1279_v1, 0.0  ;;  %v1331_v6 = vmul.f32 0.2, %v1279_v1  ;;  %v1822_v17 = vadd.f32 %v1821_v5, %v1820_v3  ;;  %v1885_v32 = vpop.f32.mrb[53].mxu1  ;;  %v1823_v7 = vpop.f32.mrb[54].mxu0  ;;  %v1346_v13 = vsel %vm1314_vm8, %v1276_v61, %v1330_v63 }
 0x161   :  { %v1886_v9 = vadd.f32 %v1885_v32, %v1884_v4  ;;  %v1887_v11 = vpop.f32.mrb[54].mxu1  ;;  %v1824_v12 = vpop.f32.mrb[55].mxu0 }
 0x162   :  { %v1347_v19 = vsel %vm1315_vm9, %v1279_v1, %v1331_v6  ;;  %v1187_v15 = vadd.f32 %v1822_v17, %v2406_v35  ;;  %v1825_v18 = vadd.f32 %v1824_v12, %v1823_v7  ;;  %v1888_v20 = vpop.f32.mrb[55].mxu1 }
 0x163   :  { %v1622_v21 = vpack.c.bf16 %v1347_v19, %v1346_v13  ;;  %v1889_v22 = vadd.f32 %v1888_v20, %v1887_v11 }
 0x164   :  { %v1284_v23 = vadd.f32 %v1886_v9, %v1187_v15  ;;  %v1190_v24 = vadd.f32 %v1825_v18, %v2409_v37 }
 0x165   :  { %1642 = vst [vmem:[%s2466_s3 + $0x20] sm:$0xff] %v1622_v21  }
 0x166   :  { %v1332_v25 = vmul.f32 0.2, %v1284_v23  ;;  %v1287_v46 = vadd.f32 %v1889_v22, %v1190_v24  ;;  %v1826_v26 = vpop.f32.mrb[56].mxu0  ;;  %vm1316_vm10 = vcmp.ge.f32.partialorder %v1284_v23, 0.0 }
 0x167   :  { %v1890_v27 = vpop.f32.mrb[56].mxu1  ;;  %v1827_v28 = vpop.f32.mrb[57].mxu0 }
 0x168   :  { %vm1317_vm11 = vcmp.ge.f32.partialorder %v1287_v46, 0.0  ;;  %v1333_v29 = vmul.f32 0.2, %v1287_v46  ;;  %v1828_v35 = vadd.f32 %v1827_v28, %v1826_v26  ;;  %v1891_v2 = vpop.f32.mrb[57].mxu1  ;;  %v1829_v31 = vpop.f32.mrb[58].mxu0  ;;  %v1348_v36 = vsel %vm1316_vm10, %v1284_v23, %v1332_v25 }
 0x169   :  { %v1892_v48 = vadd.f32 %v1891_v2, %v1890_v27  ;;  %v1893_v33 = vpop.f32.mrb[58].mxu1  ;;  %v1830_v34 = vpop.f32.mrb[59].mxu0 }
 0x16a   :  { %v1349_v37 = vsel %vm1317_vm11, %v1287_v46, %v1333_v29  ;;  %v1195_v38 = vadd.f32 %v1828_v35, %v2412_v53  ;;  %v1831_v39 = vadd.f32 %v1830_v34, %v1829_v31  ;;  %v1894_v40 = vpop.f32.mrb[59].mxu1 }
 0x16b   :  { %v1627_v41 = vpack.c.bf16 %v1349_v37, %v1348_v36  ;;  %v1895_v42 = vadd.f32 %v1894_v40, %v1893_v33 }
 0x16c   :  { %v1292_v43 = vadd.f32 %v1892_v48, %v1195_v38  ;;  %v1198_v14 = vadd.f32 %v1831_v39, %v2415_v55 }
 0x16d   :  { %1643 = vst [vmem:[%s2466_s3 + $0x28] sm:$0xff] %v1627_v41  }
 0x16e   :  { %v1334_v44 = vmul.f32 0.2, %v1292_v43  ;;  %v1295_v45 = vadd.f32 %v1895_v42, %v1198_v14  ;;  %v1832_v47 = vpop.f32.mrb[60].mxu0  ;;  %vm1318_vm12 = vcmp.ge.f32.partialorder %v1292_v43, 0.0 }
 0x16f   :  { %v1896_v62 = vpop.f32.mrb[60].mxu1  ;;  %v1833_v49 = vpop.f32.mrb[61].mxu0 }
 0x170   :  { %vm1319_vm13 = vcmp.ge.f32.partialorder %v1295_v45, 0.0  ;;  %v1335_v16 = vmul.f32 0.2, %v1295_v45  ;;  %v1834_v53 = vadd.f32 %v1833_v49, %v1832_v47  ;;  %v1897_v50 = vpop.f32.mrb[61].mxu1  ;;  %v1835_v51 = vpop.f32.mrb[62].mxu0  ;;  %v1350_v56 = vsel %vm1318_vm12, %v1292_v43, %v1334_v44 }
 0x171   :  { %v1898_v52 = vadd.f32 %v1897_v50, %v1896_v62  ;;  %v1899_v54 = vpop.f32.mrb[62].mxu1  ;;  %v1836_v0 = vpop.f32.mrb[63].mxu0 }
 0x172   :  { %v1351_v55 = vsel %vm1319_vm13, %v1295_v45, %v1335_v16  ;;  %v1203_v57 = vadd.f32 %v1834_v53, %v2418_v8  ;;  %v1837_v58 = vadd.f32 %v1836_v0, %v1835_v51  ;;  %v1900_v59 = vpop.f32.mrb[63].mxu1 }
 0x173   :  { %v1632_v60 = vpack.c.bf16 %v1351_v55, %v1350_v56  ;;  %v1901_v61 = vadd.f32 %v1900_v59, %v1899_v54 }
 0x174   :  { %v1300_v30 = vadd.f32 %v1898_v52, %v1203_v57  ;;  %v1206_v63 = vadd.f32 %v1837_v58, %v2421_v10 }
 0x175   :  { %1644 = vst [vmem:[%s2466_s3 + $0x30] sm:$0xff] %v1632_v60  }
 0x176   :  { %v1336_v1 = vmul.f32 0.2, %v1300_v30  ;;  %v1303_v3 = vadd.f32 %v1901_v61, %v1206_v63  ;;  %vm1320_vm14 = vcmp.ge.f32.partialorder %v1300_v30, 0.0 }
 0x178   :  { %vm1321_vm15 = vcmp.ge.f32.partialorder %v1303_v3, 0.0  ;;  %v1337_v4 = vmul.f32 0.2, %v1303_v3  ;;  %v1352_v5 = vsel %vm1320_vm14, %v1300_v30, %v1336_v1 }
 0x17a   :  { %v1353_v6 = vsel %vm1321_vm15, %v1303_v3, %v1337_v4 }
 0x17b   :  { %v1637_v17 = vpack.c.bf16 %v1353_v6, %v1352_v5 }
 0x17d   :  { %1645 = vst [vmem:[%s2466_s3 + $0x38] sm:$0xff] %v1637_v17  }

// kernel: discriminator_forward.5
= control target key start
LH: loop header
LB: loop body
LE: loop exit
PB: predicated region body
PF: predicated region fallthrough
CT: control target
= control target key end

     0   :  { %v56_v1 = vlaneseq  ;;  %v1124_v51 = vmov 1983009808   ;;  %vm968_vm0 = vcmask 1041408   ;;  %vm1112_vm1 = vcmask 1024   ;;  %s1885_s2 = inlined_call_operand.<no memory space> [shape: f32[1,1], index: 2, kind: input, shape index: {}]   ;;  %s1886_s1 = inlined_call_operand.vmem [shape: f32[1,8192], index: 1, kind: input, shape index: {}]   ;;  %s1887_s0 = inlined_call_operand.vmem [shape: bf16[2,8192], index: 0, kind: input, shape index: {}]   ;;  %s1888_s3 = inlined_call_operand.vmem [shape: f32[2,1], index: 3, kind: output, shape index: {}]  }
   0x1   :  { %v8_v0 = vstv %s1885_s2  ;;  %v1153_v3 = vld [vmem:[%s1886_s1 + $0x20] sm:$0xff]  ;;  %v1170_v8 = vld [vmem:[%s1886_s1 + $0x28] sm:$0xff]  ;;  %v1195_v17 = vld [vmem:[%s1886_s1 + $0x30] sm:$0xff]  ;;  %v315_v52 = vunpack.c.l.s4 %v1124_v51 }
   0x2   :  { %9 = vst [vmem:[#allocation2] sm:$0x1] %v8_v0  ;;  %v1148_v2 = vshrl.u32 %v56_v1, 7  ;;  %v1216_v26 = vld [vmem:[%s1886_s1 + $0x38] sm:$0xff]  ;;  %v1253_v43 = vld [vmem:[%s1887_s0 + $0x20] sm:$0xff]  ;;  %v1258_v44 = vld [vmem:[%s1887_s0 + $0x28] sm:$0xff] }
   0x3   :  { %v1271_v49 = vld [vmem:[%s1887_s0 + $0x30] sm:$0xff]  ;;  %v1276_v50 = vld [vmem:[%s1887_s0 + $0x38] sm:$0xff]  ;;  %v1281_v53 = vld [vmem:[%s1886_s1] sm:$0xff]  ;;  %v316_v1 = vunpack.c.0.s8 %v315_v52 }
   0x4   :  { %v1156_v4 = vsub.s32 0, %v1148_v2  ;;  %v1159_v5 = vsub.s32 1, %v1148_v2  ;;  %v1162_v6 = vsub.s32 2, %v1148_v2  ;;  %v1165_v7 = vsub.s32 3, %v1148_v2  ;;  %v1293_v61 = vld [vmem:[%s1886_s1 + $0x8] sm:$0xff]  ;;  %v1311_v62 = vld [vmem:[%s1886_s1 + $0x10] sm:$0xff] }
   0x5   :  { %v1173_v9 = vsub.s32 4, %v1148_v2  ;;  %v1176_v10 = vsub.s32 5, %v1148_v2  ;;  %v1179_v11 = vsub.s32 6, %v1148_v2  ;;  %v1182_v12 = vsub.s32 7, %v1148_v2 }
   0x6   :  { %v187_v13 = vrot.slane %v1153_v3, %v1156_v4  ;;  %v191_v14 = vrot.slane %v1153_v3, %v1159_v5  ;;  %v195_v15 = vrot.slane %v1153_v3, %v1162_v6  ;;  %v199_v16 = vrot.slane %v1153_v3, %v1165_v7 }
   0x7   :  { %v203_v18 = vrot.slane %v1153_v3, %v1173_v9  ;;  %v207_v19 = vrot.slane %v1153_v3, %v1176_v10  ;;  %v211_v20 = vrot.slane %v1153_v3, %v1179_v11  ;;  %v215_v21 = vrot.slane %v1153_v3, %v1182_v12 }
   0x8   :  { %v219_v22 = vrot.slane %v1170_v8, %v1156_v4  ;;  %v223_v23 = vrot.slane %v1170_v8, %v1159_v5  ;;  %v227_v24 = vrot.slane %v1170_v8, %v1162_v6  ;;  %v231_v25 = vrot.slane %v1170_v8, %v1165_v7 }
   0x9   :  { %v235_v27 = vrot.slane %v1170_v8, %v1173_v9  ;;  %v239_v28 = vrot.slane %v1170_v8, %v1176_v10  ;;  %v243_v29 = vrot.slane %v1170_v8, %v1179_v11  ;;  %v247_v30 = vrot.slane %v1170_v8, %v1182_v12 }
   0xa   :  { %v251_v31 = vrot.slane %v1195_v17, %v1156_v4  ;;  %v255_v32 = vrot.slane %v1195_v17, %v1159_v5  ;;  %v259_v33 = vrot.slane %v1195_v17, %v1162_v6  ;;  %v263_v34 = vrot.slane %v1195_v17, %v1165_v7 }
   0xb   :  { %v267_v35 = vrot.slane %v1195_v17, %v1173_v9  ;;  %v271_v36 = vrot.slane %v1195_v17, %v1176_v10  ;;  %v279_v38 = vrot.slane %v1195_v17, %v1182_v12  ;;  %v59_v63 = vrot.slane %v1281_v53, %v1156_v4 }
   0xc   :  { %v63_v0 = vrot.slane %v1281_v53, %v1159_v5  ;;  %v67_v51 = vrot.slane %v1281_v53, %v1162_v6  ;;  %v71_v60 = vrot.slane %v1281_v53, %v1165_v7  ;;  %v75_v59 = vrot.slane %v1281_v53, %v1173_v9 }
   0xd   :  { %v79_v58 = vrot.slane %v1281_v53, %v1176_v10  ;;  %v83_v52 = vrot.slane %v1281_v53, %v1179_v11  ;;  %v87_v57 = vrot.slane %v1281_v53, %v1182_v12  ;;  %v91_v56 = vrot.slane %v1293_v61, %v1156_v4 }
   0xe   :  { %v95_v55 = vrot.slane %v1293_v61, %v1159_v5  ;;  %v99_v54 = vrot.slane %v1293_v61, %v1162_v6  ;;  %v103_v47 = vrot.slane %v1293_v61, %v1165_v7  ;;  %v107_v48 = vrot.slane %v1293_v61, %v1173_v9 }
   0xf   :  { %v111_v45 = vrot.slane %v1293_v61, %v1176_v10  ;;  %v115_v53 = vrot.slane %v1293_v61, %v1179_v11  ;;  %v119_v46 = vrot.slane %v1293_v61, %v1182_v12  ;;  %v1334_v41 = vsub.s32 %v316_v1, %v1148_v2 }
  0x10   :  { %v448_v42 = vcombine.low %v187_v13, %v191_v14  ;;  %v123_v39 = vrot.slane %v1311_v62, %v1156_v4  ;;  %v127_v40 = vrot.slane %v1311_v62, %v1159_v5  ;;  %v131_v37 = vrot.slane %v1311_v62, %v1162_v6 }
  0x11   :  { %v449_v2 = vcombine.low %v195_v15, %v199_v16  ;;  %v135_v61 = vrot.slane %v1311_v62, %v1165_v7  ;;  %v465_v14 = vcombine.low %v203_v18, %v207_v19  ;;  %v466_v1 = vcombine.low %v211_v20, %v215_v21 }
  0x12   :  { %v456_v13 = vrot.slane %v448_v42, %v1334_v41  ;;  %v1369_v15 = vcombine.low %v59_v63, %v63_v0  ;;  %v482_v42 = vcombine.low %v219_v22, %v223_v23  ;;  %v483_v18 = vcombine.low %v227_v24, %v231_v25 }
  0x13   :  { %v463_v16 = vrot.slane %v449_v2, %v1334_v41  ;;  %v1384_v3 = vcombine.low %v67_v51, %v71_v60  ;;  %v473_v19 = vrot.slane %v465_v14, %v1334_v41  ;;  %v480_v20 = vrot.slane %v466_v1, %v1334_v41 }
  0x14   :  { %v499_v21 = vcombine.low %v235_v27, %v239_v28  ;;  %v490_v23 = vrot.slane %v482_v42, %v1334_v41  ;;  %v497_v63 = vrot.slane %v483_v18, %v1334_v41  ;;  %v500_v24 = vcombine.low %v243_v29, %v247_v30 }
  0x15   :  { %v464_v22 = vcombine.low %v456_v13, %v463_v16  ;;  %v481_v25 = vcombine.low %v473_v19, %v480_v20  ;;  %v516_v27 = vcombine.low %v251_v31, %v255_v32  ;;  %v517_v28 = vcombine.low %v259_v33, %v263_v34 }
  0x16   :  { %v507_v60 = vrot.slane %v499_v21, %v1334_v41  ;;  %v498_v0 = vcombine.low %v490_v23, %v497_v63  ;;  %v514_v8 = vrot.slane %v500_v24, %v1334_v41  ;;  %v533_v29 = vcombine.low %v267_v35, %v271_v36 }
  0x17   :  { %v1890_v30 = vrot.slane %v1195_v17, %v1179_v11  ;;  %v524_v32 = vrot.slane %v516_v27, %v1334_v41  ;;  %v531_v33 = vrot.slane %v517_v28, %v1334_v41  ;;  %v1891_v34 = vrot.slane %v1216_v26, %v1159_v5 }
  0x18   :  { %v1892_v51 = vrot.slane %v1216_v26, %v1156_v4  ;;  %v1893_v35 = vrot.slane %v1216_v26, %v1165_v7  ;;  %v1894_v36 = vrot.slane %v1216_v26, %v1162_v6  ;;  %v515_v17 = vcombine.low %v507_v60, %v514_v8 }
  0x19   :  { %v534_v31 = vcombine.low %v1890_v30, %v279_v38  ;;  %v541_v38 = vrot.slane %v533_v29, %v1334_v41  ;;  %v1895_v1 = vrot.slane %v1216_v26, %v1176_v10  ;;  %v1896_v16 = vrot.slane %v1216_v26, %v1173_v9 }
  0x1a   :  { %v550_v2 = vcombine.low %v1892_v51, %v1891_v34  ;;  %v551_v13 = vcombine.low %v1894_v36, %v1893_v35  ;;  %v532_v18 = vcombine.low %v524_v32, %v531_v33  ;;  %v1897_v21 = vrot.slane %v1216_v26, %v1182_v12  ;;  %v17_v36 = vld [vmem:[%s1887_s0 + $0x8] sm:$0xff] }
  0x1b   :  { %v548_v14 = vrot.slane %v534_v31, %v1334_v41  ;;  %v567_v42 = vcombine.low %v1896_v16, %v1895_v1  ;;  %v1898_v23 = vrot.slane %v1216_v26, %v1179_v11  ;;  %v329_v24 = vcombine.low %v75_v59, %v79_v58  ;;  %v1517_v1 = vld [vmem:[%s1887_s0 + $0x10] sm:$0xff] }
  0x1c   :  { %v558_v19 = vrot.slane %v550_v2, %v1334_v41  ;;  %v565_v20 = vrot.slane %v551_v13, %v1334_v41  ;;  %v330_v60 = vcombine.low %v83_v52, %v87_v57  ;;  %v346_v8 = vcombine.low %v91_v56, %v95_v55 }
  0x1d   :  { %v568_v63 = vcombine.low %v1898_v23, %v1897_v21  ;;  %v549_v27 = vcombine.low %v541_v38, %v548_v14  ;;  %v575_v28 = vrot.slane %v567_v42, %v1334_v41  ;;  %v347_v29 = vcombine.low %v99_v54, %v103_v47 }
  0x1e   :  { %v566_v30 = vcombine.low %v558_v19, %v565_v20  ;;  %v320_v32 = vrot.slane %v1369_v15, %v1334_v41  ;;  %v327_v33 = vrot.slane %v1384_v3, %v1334_v41  ;;  %v363_v34 = vcombine.low %v107_v48, %v111_v45 }
  0x1f   :  { %v582_v31 = vrot.slane %v568_v63, %v1334_v41  ;;  %v364_v51 = vcombine.low %v115_v53, %v119_v46  ;;  %v1899_v58 = vunpack.c.l.bf16 %v1253_v43  ;;  %v1900_v59 = vunpack.c.h.bf16 %v1253_v43  ;;  %v16_v43 = vld [vmem:[%s1887_s0] sm:$0xff] }
  0x20   :  { %v1901_v47 = vunpack.c.l.bf16 %v1258_v44  ;;  %v1902_v55 = vunpack.c.h.bf16 %v1258_v44  ;;  %v1903_v15 = vunpack.c.l.bf16 %v1271_v49  ;;  %v1904_v45 = vunpack.c.h.bf16 %v1271_v49 }
  0x21   :  { %v583_v26 = vcombine.low %v575_v28, %v582_v31  ;;  %v608_v57 = vmul.f32 %v464_v22, %v1899_v58  ;;  %v609_v52 = vmul.f32 %v481_v25, %v1900_v59  ;;  %v1905_v48 = vunpack.c.l.bf16 %v1276_v50 }
  0x22   :  { %v610_v54 = vmul.f32 %v498_v0, %v1901_v47  ;;  %v611_v56 = vmul.f32 %v515_v17, %v1902_v55  ;;  %v1474_v2 = vmul.f32 %v532_v18, %v1903_v15  ;;  %v1478_v46 = vmul.f32 %v549_v27, %v1904_v45 }
  0x23   :  { %v1482_v53 = vmul.f32 %v566_v30, %v1905_v48  ;;  %v337_v3 = vrot.slane %v329_v24, %v1334_v41  ;;  %v344_v44 = vrot.slane %v330_v60, %v1334_v41  ;;  %v1906_v22 = vunpack.c.h.bf16 %v1276_v50 }
  0x24   :  { %v354_v49 = vrot.slane %v346_v8, %v1334_v41  ;;  %v361_v0 = vrot.slane %v347_v29, %v1334_v41  ;;  %v380_v35 = vcombine.low %v123_v39, %v127_v40  ;;  %v381_v50 = vcombine.low %v131_v37, %v135_v61  ;;  %v1522_v37 = vld [vmem:[%s1886_s1 + $0x18] sm:$0xff] }
  0x25   :  { %v1491_v25 = vmul.f32 %v583_v26, %v1906_v22  ;;  %v371_v13 = vrot.slane %v363_v34, %v1334_v41  ;;  %v378_v17 = vrot.slane %v364_v51, %v1334_v41  ;;  %v24_v38 = vunpack.c.l.bf16 %v16_v43 }
  0x26   :  { %v25_v14 = vunpack.c.h.bf16 %v16_v43  ;;  %v139_v39 = vrot.slane %v1311_v62, %v1173_v9  ;;  %v328_v40 = vcombine.low %v320_v32, %v327_v33  ;;  %v143_v61 = vrot.slane %v1311_v62, %v1176_v10 }
  0x27   :  { %v147_v16 = vrot.slane %v1311_v62, %v1179_v11  ;;  %v151_v42 = vrot.slane %v1311_v62, %v1182_v12  ;;  %v345_v18 = vcombine.low %v337_v3, %v344_v44  ;;  %v26_v19 = vunpack.c.l.bf16 %v17_v36 }
  0x28   :  { %v362_v20 = vcombine.low %v354_v49, %v361_v0  ;;  %v388_v21 = vrot.slane %v380_v35, %v1334_v41  ;;  %v395_v23 = vrot.slane %v381_v50, %v1334_v41  ;;  %v27_v63 = vunpack.c.h.bf16 %v17_v36 }
  0x29   :  { %v379_v24 = vcombine.low %v371_v13, %v378_v17  ;;  %v28_v60 = vunpack.c.l.bf16 %v1517_v1  ;;  %v600_v8 = vmul.f32 %v328_v40, %v24_v38  ;;  %v1539_v29 = vcombine.low %v139_v39, %v143_v61 }
  0x2a   :  { %v1541_v30 = vcombine.low %v147_v16, %v151_v42  ;;  %v601_v31 = vmul.f32 %v345_v18, %v25_v14  ;;  %v396_v32 = vcombine.low %v388_v21, %v395_v23  ;;  %v602_v33 = vmul.f32 %v362_v20, %v26_v19 }
  0x2b   :  { %v632_v34 = vcombine.high %v600_v8, %v600_v8  ;;  %v768_v51 = vcombine.high %v608_v57, %v608_v57  ;;  %v603_v26 = vmul.f32 %v379_v24, %v27_v63  ;;  %v1544_v58 = vrot.slane %v608_v57, %v1334_v41 }
  0x2c   :  { %v785_v59 = vcombine.high %v609_v52, %v609_v52  ;;  %v1547_v47 = vrot.slane %v609_v52, %v1334_v41  ;;  %v639_v55 = vrot.slane %v600_v8, %v1334_v41  ;;  %v802_v45 = vcombine.high %v610_v54, %v610_v54 }
  0x2d   :  { %1907 = vst [vmem:[#allocation3_spill] sm:$0xff] %v1544_v58  ;;  %v1551_v15 = vrot.slane %v768_v51, %v1334_v41  ;;  %v1554_v48 = vrot.slane %v610_v54, %v1334_v41  ;;  %v649_v43 = vcombine.high %v601_v31, %v601_v31  ;;  %v656_v3 = vrot.slane %v601_v31, %v1334_v41 }
  0x2e   :  { %v1558_v44 = vrot.slane %v785_v59, %v1334_v41  ;;  %v819_v57 = vcombine.high %v611_v56, %v611_v56  ;;  %v646_v22 = vrot.slane %v632_v34, %v1334_v41  ;;  %v666_v52 = vcombine.high %v602_v33, %v602_v33 }
  0x2f   :  { %v1562_v49 = vrot.slane %v802_v45, %v1334_v41  ;;  %v1565_v0 = vrot.slane %v611_v56, %v1334_v41  ;;  %v673_v35 = vrot.slane %v602_v33, %v1334_v41  ;;  %v836_v50 = vcombine.high %v1474_v2, %v1474_v2 }
  0x30   :  { %v1569_v54 = vrot.slane %v819_v57, %v1334_v41  ;;  %v1575_v36 = vrot.slane %v1474_v2, %v1334_v41  ;;  %v647_v13 = vcombine.high %v639_v55, %v639_v55  ;;  %v683_v17 = vcombine.high %v603_v26, %v603_v26 }
  0x31   :  { %v853_v38 = vcombine.high %v1478_v46, %v1478_v46  ;;  %v1581_v56 = vrot.slane %v1478_v46, %v1334_v41  ;;  %v663_v14 = vrot.slane %v649_v43, %v1334_v41  ;;  %v1585_v39 = vrot.slane %v603_v26, %v1334_v41 }
  0x32   :  { %v1588_v40 = vrot.slane %v836_v50, %v1334_v41  ;;  %v870_v2 = vcombine.high %v1482_v53, %v1482_v53  ;;  %v648_v61 = vcombine.high %v646_v22, %v646_v22  ;;  %v1597_v42 = vrot.slane %v1482_v53, %v1334_v41 }
  0x33   :  { %v1593_v16 = vrot.slane %v853_v38, %v1334_v41  ;;  %v887_v46 = vcombine.high %v1491_v25, %v1491_v25  ;;  %v680_v18 = vrot.slane %v666_v52, %v1334_v41  ;;  %v1607_v20 = vrot.slane %v1491_v25, %v1334_v41 }
  0x34   :  { %v1603_v19 = vrot.slane %v870_v2, %v1334_v41  ;;  %v969_v21 = vsel %vm968_vm0, %v639_v55, 0.0  ;;  %v970_v24 = vsel %vm968_vm0, %v647_v13, 0.0  ;;  %v1620_v31 = vmul.f32 %v396_v32, %v28_v60 }
  0x35   :  { %v1615_v63 = vrot.slane %v887_v46, %v1334_v41  ;;  %v971_v25 = vadd.f32 %v970_v24, %v969_v21  ;;  %v972_v33 = vsel %vm968_vm0, %v646_v22, 0.0  ;;  %v664_v34 = vcombine.high %v656_v3, %v656_v3 }
  0x36   :  { %v681_v51 = vcombine.high %v673_v35, %v673_v35  ;;  %v1624_v26 = vrot.slane %v683_v17, %v1334_v41  ;;  %v974_v59 = vsel %vm968_vm0, %v648_v61, 0.0  ;;  %v665_v55 = vcombine.high %v663_v14, %v663_v14 }
  0x37   :  { %v682_v45 = vcombine.high %v680_v18, %v680_v18  ;;  %v973_v57 = vadd.f32 %v972_v33, %v971_v25  ;;  %v783_v60 = vcombine.high %v1544_v58, %v1544_v58  ;;  %v784_v32 = vcombine.high %v1551_v15, %v1551_v15 }
  0x38   :  { %v800_v22 = vcombine.high %v1547_v47, %v1547_v47  ;;  %v976_v52 = vsel %vm968_vm0, %v656_v3, 0.0  ;;  %v801_v50 = vcombine.high %v1558_v44, %v1558_v44  ;;  %v817_v13 = vcombine.high %v1554_v48, %v1554_v48 }
  0x39   :  { %v818_v17 = vcombine.high %v1562_v49, %v1562_v49  ;;  %v975_v38 = vadd.f32 %v974_v59, %v973_v57  ;;  %v834_v2 = vcombine.high %v1565_v0, %v1565_v0  ;;  %v835_v61 = vcombine.high %v1569_v54, %v1569_v54 }
  0x3a   :  { %v851_v46 = vcombine.high %v1575_v36, %v1575_v36  ;;  %v978_v3 = vsel %vm968_vm0, %v664_v34, 0.0  ;;  %v852_v21 = vcombine.high %v1588_v40, %v1588_v40  ;;  %v868_v24 = vcombine.high %v1581_v56, %v1581_v56 }
  0x3b   :  { %v869_v25 = vcombine.high %v1593_v16, %v1593_v16  ;;  %v977_v33 = vadd.f32 %v976_v52, %v975_v38  ;;  %v885_v59 = vcombine.high %v1597_v42, %v1597_v42  ;;  %v886_v57 = vcombine.high %v1603_v19, %v1603_v19 }
  0x3c   :  { %v902_v43 = vcombine.high %v1607_v20, %v1607_v20  ;;  %v980_v34 = vsel %vm968_vm0, %v663_v14, 0.0  ;;  %v903_v62 = vcombine.high %v1615_v63, %v1615_v63  ;;  %v982_v27 = vsel %vm968_vm0, %v665_v55, 0.0 }
  0x3d   :  { %v979_v23 = vadd.f32 %v978_v3, %v977_v33  ;;  %v984_v28 = vsel %vm968_vm0, %v673_v35, 0.0  ;;  %v986_v52 = vsel %vm968_vm0, %v681_v51, 0.0  ;;  %v988_v38 = vsel %vm968_vm0, %v680_v18, 0.0 }
  0x3e   :  { %v990_v53 = vsel %vm968_vm0, %v682_v45, 0.0  ;;  %v1670_v8 = vsel %vm968_vm0, %v783_v60, 0.0  ;;  %v1674_v14 = vsel %vm968_vm0, %v1551_v15, 0.0  ;;  %v1677_v3 = vsel %vm968_vm0, %v784_v32, 0.0 }
  0x3f   :  { %v981_v58 = vadd.f32 %v980_v34, %v979_v23  ;;  %v1681_v35 = vsel %vm968_vm0, %v1547_v47, 0.0  ;;  %v1684_v51 = vsel %vm968_vm0, %v800_v22, 0.0  ;;  %v1688_v18 = vsel %vm968_vm0, %v1558_v44, 0.0 }
  0x40   :  { %v1691_v23 = vsel %vm968_vm0, %v801_v50, 0.0  ;;  %v1695_v15 = vsel %vm968_vm0, %v1554_v48, 0.0  ;;  %v1698_v45 = vsel %vm968_vm0, %v817_v13, 0.0  ;;  %v1702_v47 = vsel %vm968_vm0, %v1562_v49, 0.0 }
  0x41   :  { %v983_v55 = vadd.f32 %v982_v27, %v981_v58  ;;  %v1705_v60 = vsel %vm968_vm0, %v818_v17, 0.0  ;;  %v1709_v44 = vsel %vm968_vm0, %v1565_v0, 0.0  ;;  %v1712_v32 = vsel %vm968_vm0, %v834_v2, 0.0 }
  0x42   :  { %v1716_v27 = vsel %vm968_vm0, %v1569_v54, 0.0  ;;  %v1719_v58 = vsel %vm968_vm0, %v835_v61, 0.0  ;;  %v1723_v49 = vsel %vm968_vm0, %v1575_v36, 0.0  ;;  %v1726_v22 = vsel %vm968_vm0, %v851_v46, 0.0 }
  0x43   :  { %v985_v48 = vadd.f32 %v984_v28, %v983_v55  ;;  %v1730_v0 = vsel %vm968_vm0, %v1588_v40, 0.0  ;;  %v1733_v50 = vsel %vm968_vm0, %v852_v21, 0.0  ;;  %v1737_v54 = vsel %vm968_vm0, %v1581_v56, 0.0 }
  0x44   :  { %v1740_v28 = vsel %vm968_vm0, %v868_v24, 0.0  ;;  %v1744_v36 = vsel %vm968_vm0, %v1593_v16, 0.0  ;;  %v1747_v17 = vsel %vm968_vm0, %v869_v25, 0.0  ;;  %v1751_v40 = vsel %vm968_vm0, %v1597_v42, 0.0 }
  0x45   :  { %v987_v13 = vadd.f32 %v986_v52, %v985_v48  ;;  %v1754_v2 = vsel %vm968_vm0, %v885_v59, 0.0  ;;  %v1758_v56 = vsel %vm968_vm0, %v1603_v19, 0.0  ;;  %v1761_v61 = vsel %vm968_vm0, %v886_v57, 0.0 }
  0x46   :  { %v1765_v16 = vsel %vm968_vm0, %v1607_v20, 0.0  ;;  %v1768_v46 = vsel %vm968_vm0, %v902_v43, 0.0  ;;  %v1772_v42 = vsel %vm968_vm0, %v1615_v63, 0.0  ;;  %v1775_v24 = vsel %vm968_vm0, %v903_v62, 0.0 }
  0x47   :  { %v989_v21 = vadd.f32 %v988_v38, %v987_v13  ;;  %v29_v19 = vunpack.c.h.bf16 %v1517_v1  ;;  %v992_v25 = vsel %vm968_vm0, %v1585_v39, 0.0  ;;  %v1908_v20 = vrot.slane %v1541_v30, %v1334_v41 }
  0x48   :  { %v1909_v43 = vrot.slane %v1539_v29, %v1334_v41  ;;  %v1910_v59 = vrot.slane %v1522_v37, %v1159_v5  ;;  %v1911_v63 = vrot.slane %v1522_v37, %v1156_v4  ;;  %v1912_v1 = vrot.slane %v1522_v37, %v1165_v7 }
  0x49   :  { %v1913_v57 = vrot.slane %v1522_v37, %v1162_v6  ;;  %v991_v52 = vadd.f32 %v990_v53, %v989_v21  ;;  %v699_v30 = vcombine.high %v1624_v26, %v1624_v26  ;;  %v700_v29 = vcombine.high %v1620_v31, %v1620_v31 }
  0x4a   :  { %v413_v33 = vcombine.low %v1909_v43, %v1908_v20  ;;  %v414_v62 = vcombine.low %v1911_v63, %v1910_v59  ;;  %v707_v5 = vrot.slane %v1620_v31, %v1334_v41  ;;  %v1914_v4 = vcombine.high %v1585_v39, %v1585_v39  ;;  %v19_v31 = vld [vmem:[%s1887_s0 + $0x18] sm:$0xff] }
  0x4b   :  { %v415_v34 = vcombine.low %v1913_v57, %v1912_v1  ;;  %v993_v7 = vadd.f32 %v992_v25, %v991_v52  ;;  %v171_v6 = vrot.slane %v1522_v37, %v1173_v9  ;;  %v175_v53 = vrot.slane %v1522_v37, %v1176_v10 }
  0x4c   :  { %v994_v38 = vsel %vm968_vm0, %v1914_v4, 0.0  ;;  %v179_v55 = vrot.slane %v1522_v37, %v1179_v11  ;;  %v996_v48 = vsel %vm968_vm0, %v1624_v26, 0.0  ;;  %v183_v39 = vrot.slane %v1522_v37, %v1182_v12 }
  0x4d   :  { %v422_v13 = vrot.slane %v414_v62, %v1334_v41  ;;  %v429_v9 = vrot.slane %v415_v34, %v1334_v41  ;;  %v995_v21 = vadd.f32 %v994_v38, %v993_v7  ;;  %v605_v25 = vmul.f32 %v413_v33, %v29_v19 }
  0x4e   :  { %v714_v10 = vrot.slane %v700_v29, %v1334_v41  ;;  %v715_v20 = vcombine.high %v707_v5, %v707_v5  ;;  %v998_v11 = vsel %vm968_vm0, %v699_v30, 0.0  ;;  %v30_v26 = vunpack.c.l.bf16 %v19_v31 }
  0x4f   :  { %v997_v43 = vadd.f32 %v996_v48, %v995_v21  ;;  %v1000_v59 = vsel %vm968_vm0, %v707_v5, 0.0  ;;  %v430_v63 = vcombine.low %v422_v13, %v429_v9  ;;  %v431_v1 = vcombine.low %v171_v6, %v175_v53 }
  0x50   :  { %v432_v57 = vcombine.low %v179_v55, %v183_v39  ;;  %v716_v12 = vcombine.high %v714_v10, %v714_v10  ;;  %v717_v37 = vcombine.high %v605_v25, %v605_v25  ;;  %v724_v62 = vrot.slane %v605_v25, %v1334_v41 }
  0x51   :  { %v999_v52 = vadd.f32 %v998_v11, %v997_v43  ;;  %v1002_v34 = vsel %vm968_vm0, %v715_v20, 0.0  ;;  %v1004_v33 = vsel %vm968_vm0, %v714_v10, 0.0  ;;  %v439_v29 = vrot.slane %v431_v1, %v1334_v41 }
  0x52   :  { %v446_v30 = vrot.slane %v432_v57, %v1334_v41  ;;  %v606_v38 = vmul.f32 %v430_v63, %v30_v26  ;;  %v731_v5 = vrot.slane %v717_v37, %v1334_v41  ;;  %v732_v7 = vcombine.high %v724_v62, %v724_v62 }
  0x53   :  { %v1001_v19 = vadd.f32 %v1000_v59, %v999_v52  ;;  %v1006_v6 = vsel %vm968_vm0, %v716_v12, 0.0  ;;  %v1008_v55 = vsel %vm968_vm0, %v724_v62, 0.0  ;;  %v31_v48 = vunpack.c.h.bf16 %v19_v31 }
  0x54   :  { %v447_v39 = vcombine.low %v439_v29, %v446_v30  ;;  %v733_v9 = vcombine.high %v731_v5, %v731_v5  ;;  %v734_v21 = vcombine.high %v606_v38, %v606_v38  ;;  %v741_v25 = vrot.slane %v606_v38, %v1334_v41 }
  0x55   :  { %v1003_v4 = vadd.f32 %v1002_v34, %v1001_v19  ;;  %v1010_v10 = vsel %vm968_vm0, %v732_v7, 0.0  ;;  %v1012_v11 = vsel %vm968_vm0, %v731_v5, 0.0 }
  0x56   :  { %v607_v26 = vmul.f32 %v447_v39, %v31_v48  ;;  %v748_v59 = vrot.slane %v734_v21, %v1334_v41  ;;  %v749_v63 = vcombine.high %v741_v25, %v741_v25  ;;  %v1014_v1 = vsel %vm968_vm0, %v733_v9, 0.0 }
  0x57   :  { %v1005_v53 = vadd.f32 %v1004_v33, %v1003_v4  ;;  %v1016_v31 = vsel %vm968_vm0, %v741_v25, 0.0  ;;  %v1915_v25 = vld [vmem:[#allocation3_spill] sm:$0xff] }
  0x58   :  { %v750_v12 = vcombine.high %v748_v59, %v748_v59  ;;  %v751_v37 = vcombine.high %v607_v26, %v607_v26  ;;  %v758_v62 = vrot.slane %v607_v26, %v1334_v41  ;;  %v1018_v34 = vsel %vm968_vm0, %v749_v63, 0.0 }
  0x59   :  { %v1007_v13 = vadd.f32 %v1006_v6, %v1005_v53  ;;  %v1020_v33 = vsel %vm968_vm0, %v748_v59, 0.0 }
  0x5a   :  { %v765_v30 = vrot.slane %v751_v37, %v1334_v41  ;;  %v766_v4 = vcombine.high %v758_v62, %v758_v62  ;;  %v1022_v38 = vsel %vm968_vm0, %v750_v12, 0.0  ;;  %v1024_v7 = vsel %vm968_vm0, %v758_v62, 0.0 }
  0x5b   :  { %v1009_v20 = vadd.f32 %v1008_v55, %v1007_v13  ;;  %v1032_v41 = vsel %vm968_vm0, %v1915_v25, 0.0 }
  0x5c   :  { %v767_v53 = vcombine.high %v765_v30, %v765_v30  ;;  %v1026_v55 = vsel %vm968_vm0, %v766_v4, 0.0  ;;  %v1028_v39 = vsel %vm968_vm0, %v765_v30, 0.0 }
  0x5d   :  { %v1011_v43 = vadd.f32 %v1010_v10, %v1009_v20 }
  0x5e   :  { %v1030_v9 = vsel %vm968_vm0, %v767_v53, 0.0 }
  0x5f   :  { %v1013_v57 = vadd.f32 %v1012_v11, %v1011_v43 }
  0x61   :  { %v1015_v52 = vadd.f32 %v1014_v1, %v1013_v57 }
  0x63   :  { %v1017_v19 = vadd.f32 %v1016_v31, %v1015_v52 }
  0x65   :  { %v1019_v29 = vadd.f32 %v1018_v34, %v1017_v19 }
  0x67   :  { %v1021_v5 = vadd.f32 %v1020_v33, %v1019_v29 }
  0x69   :  { %v1023_v6 = vadd.f32 %v1022_v38, %v1021_v5 }
  0x6b   :  { %v1025_v48 = vadd.f32 %v1024_v7, %v1023_v6 }
  0x6d   :  { %v1027_v13 = vadd.f32 %v1026_v55, %v1025_v48 }
  0x6f   :  { %v1029_v21 = vadd.f32 %v1028_v39, %v1027_v13 }
  0x71   :  { %v1031_v10 = vadd.f32 %v1030_v9, %v1029_v21 }
  0x73   :  { %v1033_v20 = vadd.f32 %v1032_v41, %v1031_v10 }
  0x75   :  { %v1035_v11 = vadd.f32 %v1670_v8, %v1033_v20 }
  0x77   :  { %v1037_v43 = vadd.f32 %v1674_v14, %v1035_v11 }
  0x79   :  { %v1039_v26 = vadd.f32 %v1677_v3, %v1037_v43 }
  0x7b   :  { %v1041_v59 = vadd.f32 %v1681_v35, %v1039_v26 }
  0x7d   :  { %v1043_v63 = vadd.f32 %v1684_v51, %v1041_v59 }
  0x7f   :  { %v1045_v1 = vadd.f32 %v1688_v18, %v1043_v63 }
  0x81   :  { %v1047_v57 = vadd.f32 %v1691_v23, %v1045_v1 }
  0x83   :  { %v1049_v31 = vadd.f32 %v1695_v15, %v1047_v57 }
  0x85   :  { %v1051_v52 = vadd.f32 %v1698_v45, %v1049_v31 }
  0x87   :  { %v1053_v12 = vadd.f32 %v1702_v47, %v1051_v52 }
  0x89   :  { %v1055_v8 = vadd.f32 %v1705_v60, %v1053_v12 }
  0x8b   :  { %v1057_v14 = vadd.f32 %v1709_v44, %v1055_v8 }
  0x8d   :  { %v1059_v3 = vadd.f32 %v1712_v32, %v1057_v14 }
  0x8f   :  { %v1061_v35 = vadd.f32 %v1716_v27, %v1059_v3 }
  0x91   :  { %v1063_v51 = vadd.f32 %v1719_v58, %v1061_v35 }
  0x93   :  { %v1065_v18 = vadd.f32 %v1723_v49, %v1063_v51 }
  0x95   :  { %v1067_v23 = vadd.f32 %v1726_v22, %v1065_v18 }
  0x97   :  { %v1069_v15 = vadd.f32 %v1730_v0, %v1067_v23 }
  0x99   :  { %v1071_v45 = vadd.f32 %v1733_v50, %v1069_v15 }
  0x9b   :  { %v1073_v47 = vadd.f32 %v1737_v54, %v1071_v45 }
  0x9d   :  { %v1075_v60 = vadd.f32 %v1740_v28, %v1073_v47 }
  0x9f   :  { %v1077_v44 = vadd.f32 %v1744_v36, %v1075_v60  ;;  %v1118_v36 = vld [vmem:[#allocation2] ss:$0 sm:$0xff] }
  0xa1   :  { %v1079_v32 = vadd.f32 %v1747_v17, %v1077_v44 }
  0xa3   :  { %v1081_v27 = vadd.f32 %v1751_v40, %v1079_v32 }
  0xa5   :  { %v1083_v58 = vadd.f32 %v1754_v2, %v1081_v27 }
  0xa7   :  { %v1085_v49 = vadd.f32 %v1758_v56, %v1083_v58 }
  0xa9   :  { %v1087_v22 = vadd.f32 %v1761_v61, %v1085_v49 }
  0xab   :  { %v1089_v0 = vadd.f32 %v1765_v16, %v1087_v22 }
  0xad   :  { %v1091_v50 = vadd.f32 %v1768_v46, %v1089_v0 }
  0xaf   :  { %v1093_v54 = vadd.f32 %v1772_v42, %v1091_v50 }
  0xb1   :  { %v1095_v28 = vadd.f32 %v1775_v24, %v1093_v54 }
  0xb3   :  { %1096 = vadd.xlane.f32.xlu0 %v1095_v28 }
 0x140   :  { %v1097_v37 = vpop.xlane.xlu0 %1096 }
 0x141   :  { %v1105_v17 = vadd.f32 %v1118_v36, %v1097_v37 }
 0x143   :  { %v1106_v62 = vsub.f32 0.0, %v1105_v17 }
 0x145   :  { %v1107_v40 = vmul.f32 1.442695, %v1106_v62 }
 0x147   :  { %1120 = vpow2.f32 %v1107_v40 }
 0x151   :  { %v1121_v2 = vpop.eup %1120 }
 0x152   :  { %v1109_v34 = vadd.f32 1.0, %v1121_v2 }
 0x154   :  { %1122 = vrcp.f32 %v1109_v34 }
 0x15e   :  { %v1123_v56 = vpop.eup %1122 }
 0x15f   :  { %1113 = vst.msk [vmem:[%s1888_s3] sm:$0x3] %vm1112_vm1, %v1123_v56 }

</bundles_post_ra>
